<compile_context>
chip_gen: v7x
topology: tpu7x:2x2x1
jax: 0.10.0
libtpu: 0.0.40
codegen_flags: <defaults>
</compile_context>

<pallas_src>
import functools

import numpy as np
import jax
import jax.numpy as jnp
from jax import lax
from jax.experimental import pallas as pl
from jax.experimental.pallas import tpu as pltpu


# ----------------------------------------------------------------------------------
# Kernel A: 3x3 offset conv (single MXU dot over an in-VMEM im2col slab) + bias
#           + per-batch BatchNorm partial statistics.  Batch axis is "parallel".
# ----------------------------------------------------------------------------------
def _offset_conv_kernel(xp_ref, w_ref, b_ref, raw_ref, sum_ref, ssq_ref, slab_ref,
                        *, W, H, C):
    # Build the [WH, 9C] im2col slab once in VMEM scratch (9 shifted taps), then issue
    # a single matmul with contraction depth 9C instead of 9 tiny per-tap dots.
    for t in range(9):
        dy, dx = divmod(t, 3)
        slab_ref[:, t * C:(t + 1) * C] = xp_ref[dy:dy + W, dx:dx + H, :].reshape(W * H, C)
    raw = jnp.dot(slab_ref[...], w_ref[...],
                  preferred_element_type=jnp.float32) + b_ref[...]
    raw_ref[...] = raw
    # Per-batch partial BN stats (reduced over B in the wrapper) -> batch axis can be
    # "parallel" (megacore split on v7x) instead of an "arbitrary" accumulator axis.
    sum_ref[...] = jnp.sum(raw, axis=0, keepdims=True)
    ssq_ref[...] = jnp.sum(raw * raw, axis=0, keepdims=True)


def offset_conv3x3_with_stats(x_nhwc, w, b):
    # x_nhwc: [B, W, H, C]; w: [O, C, 3, 3]; b: [O]  (PyTorch Conv2d layout)
    B, W, H, C = x_nhwc.shape
    O = w.shape[0]
    WH = W * H
    xp = jnp.pad(x_nhwc, ((0, 0), (1, 1), (1, 1), (0, 0)))
    w2 = jnp.transpose(w, (2, 3, 1, 0)).reshape(9 * C, O)   # rows ordered (dy, dx, c)
    b2 = b.reshape(1, O)
    return pl.pallas_call(
        functools.partial(_offset_conv_kernel, W=W, H=H, C=C),
        out_shape=(
            jax.ShapeDtypeStruct((B, WH, O), jnp.float32),   # conv output (pre-BN)
            jax.ShapeDtypeStruct((B, 1, O), jnp.float32),    # per-batch channel sum
            jax.ShapeDtypeStruct((B, 1, O), jnp.float32),    # per-batch channel sum sq
        ),
        grid=(B,),
        in_specs=[
            pl.BlockSpec((None, W + 2, H + 2, C), lambda i: (i, 0, 0, 0)),
            pl.BlockSpec((9 * C, O), lambda i: (0, 0)),
            pl.BlockSpec((1, O), lambda i: (0, 0)),
        ],
        out_specs=(
            pl.BlockSpec((None, WH, O), lambda i: (i, 0, 0)),
            pl.BlockSpec((None, 1, O), lambda i: (i, 0, 0)),
            pl.BlockSpec((None, 1, O), lambda i: (i, 0, 0)),
        ),
        scratch_shapes=[pltpu.VMEM((WH, 9 * C), jnp.float32)],
        compiler_params=pltpu.CompilerParams(dimension_semantics=("parallel",)),
        cost_estimate=pl.CostEstimate(
            flops=2 * B * WH * 9 * C * O,
            transcendentals=0,
            bytes_accessed=4 * (B * (W + 2) * (H + 2) * C + B * WH * O + 9 * C * O)),
    )(xp, w2, b2)


# ----------------------------------------------------------------------------------
# Kernel B (fused): BN-normalize + tanh + snake coordinates + bilinear sampling +
#                   dsc (K,1)/(1,K) conv matmul + per-tile GroupNorm partial stats.
#   * K taps batched into ONE gather matmul (block-diag feature matrix) and ONE
#     selection matmul whose weights fold in the dsc conv weights.
#   * Single HBM store per tile, output already [B, WH, O].
# ----------------------------------------------------------------------------------
def _deform_dsc_kernel(raw_ref, consts_ref, mxy_ref, featbd_ref, selw_ref, bias_ref,
                       y_ref, psum_ref, pssq_ref, ox_ref, oy_ref, *, W, H, C, K, T):
    ti = pl.program_id(1)

    # (1) BatchNorm (precomputed scale/shift) + tanh -> offset field for this row tile.
    scale = consts_ref[0:1, :]                                         # [1, 2K]
    shift = consts_ref[1:2, :]
    base = consts_ref[2:3, :]                                          # tap base (ky|kx)
    off = jnp.tanh(raw_ref[...] * scale + shift)                       # [T, 2K]

    # (2) Snake coordinate maps.  Rows are flattened (w, h); one small combined dot.
    rows = ti * T + lax.broadcasted_iota(jnp.int32, (T, 1), 0)         # global (w,h) row
    wrow = (rows // H).astype(jnp.float32)
    hrow = (rows % H).astype(jnp.float32)
    coords = base + jnp.dot(off, mxy_ref[...],
                            preferred_element_type=jnp.float32)        # [T, 2K]
    ycoord = wrow + coords[:, :K]                                       # [T, K]
    xcoord = hrow + coords[:, K:]                                       # [T, K]

    # (3) Bilinear sampling with separable, tap-batched interpolation weights.
    #     ox_all [T, K*H]   : x-direction (H) one-hot weights, all K taps stacked.
    #     oy_all [T, K*W*C] : y-direction (W) weights expanded over (w, c) lanes.
    iota_h = lax.broadcasted_iota(jnp.int32, (T, H), 1)
    wlane = lax.broadcasted_iota(jnp.int32, (T, W * C), 1) // C
    for k in range(K):
        y = ycoord[:, k:k + 1]                                          # [T, 1]
        x = xcoord[:, k:k + 1]
        y0f = jnp.floor(y)
        x0f = jnp.floor(x)
        # gather indices: tight clamp (reference behaviour)
        y0i = jnp.clip(y0f.astype(jnp.int32), 0, W - 1)
        y1i = jnp.clip(y0f.astype(jnp.int32) + 1, 0, W - 1)
        x0i = jnp.clip(x0f.astype(jnp.int32), 0, H - 1)
        x1i = jnp.clip(x0f.astype(jnp.int32) + 1, 0, H - 1)
        # interpolation weights: looser clamp [0, W] / [0, H] (reference behaviour)
        y0v = jnp.clip(y0f, 0.0, float(W))
        y1v = jnp.clip(y0f + 1.0, 0.0, float(W))
        x0v = jnp.clip(x0f, 0.0, float(H))
        x1v = jnp.clip(x0f + 1.0, 0.0, float(H))
        wy0 = y1v - y
        wy1 = y - y0v
        wx0 = x1v - x
        wx1 = x - x0v
        ox_ref[:, k * H:(k + 1) * H] = wx0 * (iota_h == x0i) + wx1 * (iota_h == x1i)
        oy_ref[:, k * W * C:(k + 1) * W * C] = (wy0 * (wlane == y0i)
                                                + wy1 * (wlane == y1i))

    # One gather matmul against the block-diagonal (per-tap) feature matrix (batch 0 --
    # the reference samples all batches from batch 0), then one selection matmul whose
    # weights already contain the dsc conv weights -> output is the dsc conv result.
    gath = jnp.dot(ox_ref[...], featbd_ref[...],
                   preferred_element_type=jnp.float32)                  # [T, K*W*C]
    y_tile = jnp.dot(oy_ref[...] * gath, selw_ref[...],
                     preferred_element_type=jnp.float32) + bias_ref[...]  # [T, O]

    # Per-tile GroupNorm partial stats (reduced in the wrapper).
    psum_ref[...] = jnp.sum(y_tile, axis=0, keepdims=True)
    pssq_ref[...] = jnp.sum(y_tile * y_tile, axis=0, keepdims=True)

    # Single store per tile.
    y_ref[...] = y_tile


def deform_dsc_fused(raw, consts, mxy, feat_bd, sel_w, bias, *, W, H, C, K, T):
    B, WH, K2 = raw.shape
    NT = WH // T
    O = sel_w.shape[-1]
    KWC = K * W * C
    flops = B * WH * (2 * K2 * K2 + 2 * (K * H) * KWC + 2 * KWC * O + KWC + 40 * K)
    bytes_accessed = 4 * (B * WH * (K2 + O) + (K * H) * KWC + KWC * O + 4 * B * NT * O)
    return pl.pallas_call(
        functools.partial(_deform_dsc_kernel, W=W, H=H, C=C, K=K, T=T),
        out_shape=(
            jax.ShapeDtypeStruct((B, WH, O), jnp.float32),     # dsc conv output (pre-GN)
            jax.ShapeDtypeStruct((B, NT, 1, O), jnp.float32),  # GN partial sum
            jax.ShapeDtypeStruct((B, NT, 1, O), jnp.float32),  # GN partial sum of squares
        ),
        grid=(B, NT),
        in_specs=[
            pl.BlockSpec((None, T, K2), lambda b, t: (b, t, 0)),     # pre-BN conv output
            pl.BlockSpec((3, K2), lambda b, t: (0, 0)),              # BN scale/shift + tap base
            pl.BlockSpec((K2, K2), lambda b, t: (0, 0)),             # offset cumulate matrix
            pl.BlockSpec((K * H, KWC), lambda b, t: (0, 0)),         # block-diag batch-0 feats
            pl.BlockSpec((KWC, O), lambda b, t: (0, 0)),             # w-sum selector x dsc weights
            pl.BlockSpec((1, O), lambda b, t: (0, 0)),               # dsc bias
        ],
        out_specs=(
            pl.BlockSpec((None, T, O), lambda b, t: (b, t, 0)),
            pl.BlockSpec((None, None, 1, O), lambda b, t: (b, t, 0, 0)),
            pl.BlockSpec((None, None, 1, O), lambda b, t: (b, t, 0, 0)),
        ),
        scratch_shapes=[
            pltpu.VMEM((T, K * H), jnp.float32),
            pltpu.VMEM((T, KWC), jnp.float32),
        ],
        compiler_params=pltpu.CompilerParams(
            dimension_semantics=("parallel", "parallel"),
            vmem_limit_bytes=32 * 1024 * 1024,   # conservative for v7x's 64 MiB VMEM
        ),
        cost_estimate=pl.CostEstimate(
            flops=int(flops), transcendentals=B * WH * K2,
            bytes_accessed=int(bytes_accessed)),
    )(raw, consts, mxy, feat_bd, sel_w, bias)


# ----------------------------------------------------------------------------------
# Kernel C: GroupNorm-apply (precomputed per-sample scale/shift) + SiLU, row-tiled.
# ----------------------------------------------------------------------------------
def _gn_silu_kernel(y_ref, sc_ref, sh_ref, o_ref):
    z = y_ref[...] * sc_ref[...] + sh_ref[...]
    o_ref[...] = z * jax.nn.sigmoid(z)               # SiLU


def gn_silu_apply(y, gn_scale, gn_shift, *, T):
    B, WH, O = y.shape
    NT = WH // T
    return pl.pallas_call(
        _gn_silu_kernel,
        out_shape=jax.ShapeDtypeStruct((B, WH, O), jnp.float32),
        grid=(B, NT),
        in_specs=[
            pl.BlockSpec((None, T, O), lambda b, t: (b, t, 0)),
            pl.BlockSpec((None, 1, O), lambda b, t: (b, 0, 0)),
            pl.BlockSpec((None, 1, O), lambda b, t: (b, 0, 0)),
        ],
        out_specs=pl.BlockSpec((None, T, O), lambda b, t: (b, t, 0)),
        compiler_params=pltpu.CompilerParams(
            dimension_semantics=("parallel", "parallel")),
        cost_estimate=pl.CostEstimate(
            flops=4 * B * WH * O, transcendentals=B * WH * O,
            bytes_accessed=4 * (2 * B * WH * O + 2 * B * O)),
    )(y, gn_scale, gn_shift)


# ----------------------------------------------------------------------------------
# Wrapper glue
# ----------------------------------------------------------------------------------
def _cum_matrix(K):
    # Linear map encoding the reference's cumulative-offset rule (new = off @ M).
    center = K // 2
    eye = np.eye(K, dtype=np.float32)
    new = [eye[i].copy() for i in range(K)]
    new[center] = np.zeros(K, np.float32)
    for idx in range(1, center):
        new[center + idx] = new[center + idx - 1] + eye[center + idx]
        new[center - idx] = new[center - idx + 1] + eye[center - idx]
    return np.stack(new, axis=1)  # [K, K]


def _row_tile(wh, *, bytes_per_row, vmem_budget=8 << 20):
    # Largest multiple-of-128 row tile dividing WH whose per-tile working set fits the
    # budget (keeps kernel B well under v7x's 64 MiB VMEM even with double buffering).
    cap = max(128, vmem_budget // max(bytes_per_row, 1))
    for t in (2048, 1024, 512, 256, 128):
        if t <= cap and wh % t == 0:
            return t
    return wh   # odd spatial sizes: one tile per sample (NT == 1); still correct.


def dsconv_forward(x_nchw, params, *, kernel_size, morph, if_offset=True, extend_scope=1.0):
    B, C, W, H = x_nchw.shape
    K = kernel_size
    WH = W * H
    K2 = 2 * K
    x_nhwc = jnp.transpose(x_nchw, (0, 2, 3, 1)).astype(jnp.float32)

    # 1) offset conv (+ per-batch BN partial statistics; reduced here over B)
    raw, bsum, bssq = offset_conv3x3_with_stats(x_nhwc, params["offset_w"], params["offset_b"])
    n = float(B * WH)
    csum = jnp.sum(bsum, axis=(0, 1))
    cssq = jnp.sum(bssq, axis=(0, 1))
    mean = csum / n
    var = jnp.maximum(cssq / n - mean * mean, 0.0)   # biased var, PyTorch training-mode BN
    rstd = lax.rsqrt(var + 1e-5)
    bn_scale = params["bn_gamma"] * rstd
    bn_shift = params["bn_beta"] - mean * bn_scale

    # 2) tiny constants for the fused sampling + dsc-conv kernel
    MY = np.zeros((K2, K), np.float32)
    MX = np.zeros((K2, K), np.float32)
    ky = np.zeros((1, K), np.float32)
    kx = np.zeros((1, K), np.float32)
    taps = (np.arange(K, dtype=np.float32) - (K // 2)).reshape(1, K)
    M = _cum_matrix(K) * float(extend_scope)
    if morph == 0:
        kx[:] = taps                      # x = h + (k - center)
        if if_offset:
            MY[:K, :] = M                 # y = w + cumulate(y_offset) * extend_scope
    else:
        ky[:] = taps                      # y = w + (k - center)
        if if_offset:
            MX[K:, :] = M                 # x = h + cumulate(x_offset) * extend_scope
    MXY = jnp.asarray(np.concatenate([MY, MX], axis=1))                 # [2K, 2K]
    base = jnp.asarray(np.concatenate([ky, kx], axis=1))                # [1, 2K]
    consts = jnp.concatenate(
        [bn_scale.reshape(1, K2), bn_shift.reshape(1, K2), base], axis=0)  # [3, 2K]

    # Reference bug reproduced: ALL batches sample feature values from batch 0.
    feat = jnp.transpose(x_nhwc[0], (1, 0, 2)).reshape(H, W * C)        # [H, W*C], f32
    feat_bd = jnp.kron(jnp.eye(K, dtype=jnp.float32), feat)             # [K*H, K*W*C]

    # dsc conv weights folded into the per-w selection matrix:
    #   sel_w[k*W*C + w*C + c, o] = dsc_weight[o, c, k]   (independent of w)
    if morph == 0:
        wk = jnp.transpose(params["dsc_w"][:, :, :, 0], (2, 1, 0))      # [K, C, O]
    else:
        wk = jnp.transpose(params["dsc_w"][:, :, 0, :], (2, 1, 0))      # [K, C, O]
    O = wk.shape[-1]
    sel_w = jnp.broadcast_to(wk[:, None, :, :], (K, W, C, O)).reshape(K * W * C, O)
    dsc_bias = params["dsc_b"].reshape(1, O)

    T = _row_tile(WH, bytes_per_row=K * W * C * 4 * 6)
    y, psum, pssq = deform_dsc_fused(
        raw, consts, MXY, feat_bd, sel_w, dsc_bias,
        W=W, H=H, C=C, K=K, T=T)                                        # y: [B, WH, O]

    # 3) GroupNorm statistics from kernel B's partials, then normalize + SiLU (kernel C).
    num_groups = O // 4                       # reference: nn.GroupNorm(out_ch // 4, out_ch)
    cpg = O // num_groups
    csum_y = jnp.sum(psum, axis=(1, 2))       # [B, O]
    cssq_y = jnp.sum(pssq, axis=(1, 2))       # [B, O]
    gsum = csum_y.reshape(B, num_groups, cpg).sum(-1)
    gssq = cssq_y.reshape(B, num_groups, cpg).sum(-1)
    ng = float(WH * cpg)
    gmean = gsum / ng
    gvar = jnp.maximum(gssq / ng - gmean * gmean, 0.0)   # biased var (PyTorch GroupNorm)
    grstd = lax.rsqrt(gvar + 1e-5)
    mean_c = jnp.repeat(gmean, cpg, axis=1)              # [B, O]
    rstd_c = jnp.repeat(grstd, cpg, axis=1)              # [B, O]
    gamma = params["gn_gamma"][None, :]
    beta = params["gn_beta"][None, :]
    gn_scale = (gamma * rstd_c).reshape(B, 1, O)
    gn_shift = (beta - mean_c * gamma * rstd_c).reshape(B, 1, O)

    out = gn_silu_apply(y, gn_scale, gn_shift, T=T)      # [B, WH, O]
    return jnp.transpose(out.reshape(B, W, H, O), (0, 3, 1, 2))         # back to NCHW


if __name__ == "__main__":
    B, in_ch, out_ch, W, H, K = 2, 4, 8, 16, 16, 3
    key = jax.random.PRNGKey(0)
    kx0, k1, k2, k3, k4, k5, k6 = jax.random.split(key, 7)

    x = jax.random.normal(kx0, (B, in_ch, W, H), dtype=jnp.float32)

    base_params = {
        "offset_w": 0.1 * jax.random.normal(k1, (2 * K, in_ch, 3, 3), jnp.float32),
        "offset_b": 0.1 * jax.random.normal(k2, (2 * K,), jnp.float32),
        "bn_gamma": jnp.ones((2 * K,), jnp.float32),
        "bn_beta": jnp.zeros((2 * K,), jnp.float32),
        "gn_gamma": jnp.ones((out_ch,), jnp.float32),
        "gn_beta": jnp.zeros((out_ch,), jnp.float32),
    }
    params_m0 = dict(
        base_params,
        dsc_w=0.1 * jax.random.normal(k3, (out_ch, in_ch, K, 1), jnp.float32),
        dsc_b=0.1 * jax.random.normal(k4, (out_ch,), jnp.float32),
    )
    params_m1 = dict(
        base_params,
        dsc_w=0.1 * jax.random.normal(k5, (out_ch, in_ch, 1, K), jnp.float32),
        dsc_b=0.1 * jax.random.normal(k6, (out_ch,), jnp.float32),
    )

    out0 = dsconv_forward(x, params_m0, kernel_size=K, morph=0, if_offset=True, extend_scope=1.0)
    out1 = dsconv_forward(x, params_m1, kernel_size=K, morph=1, if_offset=True, extend_scope=1.0)
    jax.block_until_ready((out0, out1))

    assert out0.shape == (B, out_ch, W, H), out0.shape
    assert out1.shape == (B, out_ch, W, H), out1.shape
    assert bool(jnp.all(jnp.isfinite(out0))) and bool(jnp.all(jnp.isfinite(out1)))
    print("KERNEL_OK")
</pallas_src>

<mosaic_0001>
module attributes {stable_mosaic.version = 11 : i64} {
  func.func @_offset_conv_kernel(%arg0: i32, %arg1: memref<1x18x18x4xf32, #tpu.memory_space<vmem>>, %arg2: memref<36x6xf32, #tpu.memory_space<vmem>>, %arg3: memref<1x6xf32, #tpu.memory_space<vmem>>, %arg4: memref<1x256x6xf32, #tpu.memory_space<vmem>>, %arg5: memref<1x1x6xf32, #tpu.memory_space<vmem>>, %arg6: memref<1x1x6xf32, #tpu.memory_space<vmem>>, %arg7: memref<256x36xf32, #tpu.memory_space<vmem>>) attributes {dimension_semantics = [#tpu.dimension_semantics<parallel>], iteration_bounds = array<i64: 2>, scalar_prefetch = 0 : i64, scratch_operands = 1 : i64, tpu.core_type = #tpu.core_type<tc>, window_params = [{transform_indices = @transform_0, window_bounds = array<i64: 1, 18, 18, 4>}, {pipeline_mode = #tpu.pipeline_mode<synchronous>, transform_indices = @transform_1, window_bounds = array<i64: 36, 6>}, {pipeline_mode = #tpu.pipeline_mode<synchronous>, transform_indices = @transform_2, window_bounds = array<i64: 1, 6>}, {transform_indices = @transform_3, window_bounds = array<i64: 1, 256, 6>}, {transform_indices = @transform_4, window_bounds = array<i64: 1, 1, 6>}, {transform_indices = @transform_5, window_bounds = array<i64: 1, 1, 6>}]} {
    %c0 = arith.constant 0 : index
    %c0_0 = arith.constant 0 : index
    %c0_1 = arith.constant 0 : index
    %c0_2 = arith.constant 0 : index
    %0 = vector.load %arg1[%c0, %c0_0, %c0_1, %c0_2] : memref<1x18x18x4xf32, #tpu.memory_space<vmem>>, vector<1x16x16x4xf32>
    %1 = vector.shape_cast %0 : vector<1x16x16x4xf32> to vector<16x16x4xf32>
    %2 = vector.shape_cast %1 : vector<16x16x4xf32> to vector<256x4xf32>
    %c0_3 = arith.constant 0 : index
    %c0_4 = arith.constant 0 : index
    %3 = vector.load %arg7[%c0_3, %c0_4] : memref<256x36xf32, #tpu.memory_space<vmem>>, vector<256x4xf32>
    tpu.vector_store %arg7[%c0_3, %c0_4], %2 {strides = array<i32>} : memref<256x36xf32, #tpu.memory_space<vmem>>, vector<256x4xf32>,
    %c0_5 = arith.constant 0 : index
    %c0_6 = arith.constant 0 : index
    %c1 = arith.constant 1 : index
    %c0_7 = arith.constant 0 : index
    %4 = vector.load %arg1[%c0_5, %c0_6, %c1, %c0_7] : memref<1x18x18x4xf32, #tpu.memory_space<vmem>>, vector<1x16x16x4xf32>
    %5 = vector.shape_cast %4 : vector<1x16x16x4xf32> to vector<16x16x4xf32>
    %6 = vector.shape_cast %5 : vector<16x16x4xf32> to vector<256x4xf32>
    %c0_8 = arith.constant 0 : index
    %c4 = arith.constant 4 : index
    %7 = vector.load %arg7[%c0_8, %c4] : memref<256x36xf32, #tpu.memory_space<vmem>>, vector<256x4xf32>
    tpu.vector_store %arg7[%c0_8, %c4], %6 {strides = array<i32>} : memref<256x36xf32, #tpu.memory_space<vmem>>, vector<256x4xf32>,
    %c0_9 = arith.constant 0 : index
    %c0_10 = arith.constant 0 : index
    %c2 = arith.constant 2 : index
    %c0_11 = arith.constant 0 : index
    %8 = vector.load %arg1[%c0_9, %c0_10, %c2, %c0_11] : memref<1x18x18x4xf32, #tpu.memory_space<vmem>>, vector<1x16x16x4xf32>
    %9 = vector.shape_cast %8 : vector<1x16x16x4xf32> to vector<16x16x4xf32>
    %10 = vector.shape_cast %9 : vector<16x16x4xf32> to vector<256x4xf32>
    %c0_12 = arith.constant 0 : index
    %c8 = arith.constant 8 : index
    %11 = vector.load %arg7[%c0_12, %c8] : memref<256x36xf32, #tpu.memory_space<vmem>>, vector<256x4xf32>
    tpu.vector_store %arg7[%c0_12, %c8], %10 {strides = array<i32>} : memref<256x36xf32, #tpu.memory_space<vmem>>, vector<256x4xf32>,
    %c0_13 = arith.constant 0 : index
    %c1_14 = arith.constant 1 : index
    %c0_15 = arith.constant 0 : index
    %c0_16 = arith.constant 0 : index
    %12 = vector.load %arg1[%c0_13, %c1_14, %c0_15, %c0_16] : memref<1x18x18x4xf32, #tpu.memory_space<vmem>>, vector<1x16x16x4xf32>
    %13 = vector.shape_cast %12 : vector<1x16x16x4xf32> to vector<16x16x4xf32>
    %14 = vector.shape_cast %13 : vector<16x16x4xf32> to vector<256x4xf32>
    %c0_17 = arith.constant 0 : index
    %c12 = arith.constant 12 : index
    %15 = vector.load %arg7[%c0_17, %c12] : memref<256x36xf32, #tpu.memory_space<vmem>>, vector<256x4xf32>
    tpu.vector_store %arg7[%c0_17, %c12], %14 {strides = array<i32>} : memref<256x36xf32, #tpu.memory_space<vmem>>, vector<256x4xf32>,
    %c0_18 = arith.constant 0 : index
    %c1_19 = arith.constant 1 : index
    %c1_20 = arith.constant 1 : index
    %c0_21 = arith.constant 0 : index
    %16 = vector.load %arg1[%c0_18, %c1_19, %c1_20, %c0_21] : memref<1x18x18x4xf32, #tpu.memory_space<vmem>>, vector<1x16x16x4xf32>
    %17 = vector.shape_cast %16 : vector<1x16x16x4xf32> to vector<16x16x4xf32>
    %18 = vector.shape_cast %17 : vector<16x16x4xf32> to vector<256x4xf32>
    %c0_22 = arith.constant 0 : index
    %c16 = arith.constant 16 : index
    %19 = vector.load %arg7[%c0_22, %c16] : memref<256x36xf32, #tpu.memory_space<vmem>>, vector<256x4xf32>
    tpu.vector_store %arg7[%c0_22, %c16], %18 {strides = array<i32>} : memref<256x36xf32, #tpu.memory_space<vmem>>, vector<256x4xf32>,
    %c0_23 = arith.constant 0 : index
    %c1_24 = arith.constant 1 : index
    %c2_25 = arith.constant 2 : index
    %c0_26 = arith.constant 0 : index
    %20 = vector.load %arg1[%c0_23, %c1_24, %c2_25, %c0_26] : memref<1x18x18x4xf32, #tpu.memory_space<vmem>>, vector<1x16x16x4xf32>
    %21 = vector.shape_cast %20 : vector<1x16x16x4xf32> to vector<16x16x4xf32>
    %22 = vector.shape_cast %21 : vector<16x16x4xf32> to vector<256x4xf32>
    %c0_27 = arith.constant 0 : index
    %c20 = arith.constant 20 : index
    %23 = vector.load %arg7[%c0_27, %c20] : memref<256x36xf32, #tpu.memory_space<vmem>>, vector<256x4xf32>
    tpu.vector_store %arg7[%c0_27, %c20], %22 {strides = array<i32>} : memref<256x36xf32, #tpu.memory_space<vmem>>, vector<256x4xf32>,
    %c0_28 = arith.constant 0 : index
    %c2_29 = arith.constant 2 : index
    %c0_30 = arith.constant 0 : index
    %c0_31 = arith.constant 0 : index
    %24 = vector.load %arg1[%c0_28, %c2_29, %c0_30, %c0_31] : memref<1x18x18x4xf32, #tpu.memory_space<vmem>>, vector<1x16x16x4xf32>
    %25 = vector.shape_cast %24 : vector<1x16x16x4xf32> to vector<16x16x4xf32>
    %26 = vector.shape_cast %25 : vector<16x16x4xf32> to vector<256x4xf32>
    %c0_32 = arith.constant 0 : index
    %c24 = arith.constant 24 : index
    %27 = vector.load %arg7[%c0_32, %c24] : memref<256x36xf32, #tpu.memory_space<vmem>>, vector<256x4xf32>
    tpu.vector_store %arg7[%c0_32, %c24], %26 {strides = array<i32>} : memref<256x36xf32, #tpu.memory_space<vmem>>, vector<256x4xf32>,
    %c0_33 = arith.constant 0 : index
    %c2_34 = arith.constant 2 : index
    %c1_35 = arith.constant 1 : index
    %c0_36 = arith.constant 0 : index
    %28 = vector.load %arg1[%c0_33, %c2_34, %c1_35, %c0_36] : memref<1x18x18x4xf32, #tpu.memory_space<vmem>>, vector<1x16x16x4xf32>
    %29 = vector.shape_cast %28 : vector<1x16x16x4xf32> to vector<16x16x4xf32>
    %30 = vector.shape_cast %29 : vector<16x16x4xf32> to vector<256x4xf32>
    %c0_37 = arith.constant 0 : index
    %c28 = arith.constant 28 : index
    %31 = vector.load %arg7[%c0_37, %c28] : memref<256x36xf32, #tpu.memory_space<vmem>>, vector<256x4xf32>
    tpu.vector_store %arg7[%c0_37, %c28], %30 {strides = array<i32>} : memref<256x36xf32, #tpu.memory_space<vmem>>, vector<256x4xf32>,
    %c0_38 = arith.constant 0 : index
    %c2_39 = arith.constant 2 : index
    %c2_40 = arith.constant 2 : index
    %c0_41 = arith.constant 0 : index
    %32 = vector.load %arg1[%c0_38, %c2_39, %c2_40, %c0_41] : memref<1x18x18x4xf32, #tpu.memory_space<vmem>>, vector<1x16x16x4xf32>
    %33 = vector.shape_cast %32 : vector<1x16x16x4xf32> to vector<16x16x4xf32>
    %34 = vector.shape_cast %33 : vector<16x16x4xf32> to vector<256x4xf32>
    %c0_42 = arith.constant 0 : index
    %c32 = arith.constant 32 : index
    %35 = vector.load %arg7[%c0_42, %c32] : memref<256x36xf32, #tpu.memory_space<vmem>>, vector<256x4xf32>
    tpu.vector_store %arg7[%c0_42, %c32], %34 {strides = array<i32>} : memref<256x36xf32, #tpu.memory_space<vmem>>, vector<256x4xf32>,
    %c0_43 = arith.constant 0 : index
    %c0_44 = arith.constant 0 : index
    %36 = vector.load %arg7[%c0_43, %c0_44] : memref<256x36xf32, #tpu.memory_space<vmem>>, vector<256x36xf32>
    %c0_45 = arith.constant 0 : index
    %c0_46 = arith.constant 0 : index
    %37 = vector.load %arg2[%c0_45, %c0_46] : memref<36x6xf32, #tpu.memory_space<vmem>>, vector<36x6xf32>
    %cst = arith.constant dense<0.000000e+00> : vector<256x6xf32>
    %38 = tpu.matmul %36, %37, %cst {dimension_numbers = #tpu.dot_dimension_numbers<[1], [0], [0], [1], [0, 0, 1, 1], [], []>} : vector<256x36xf32>, vector<36x6xf32>, vector<256x6xf32> -> vector<256x6xf32>
    %c0_47 = arith.constant 0 : index
    %c0_48 = arith.constant 0 : index
    %39 = vector.load %arg3[%c0_47, %c0_48] : memref<1x6xf32, #tpu.memory_space<vmem>>, vector<1x6xf32>
    %40 = vector.broadcast %39 : vector<1x6xf32> to vector<256x6xf32>
    %41 = arith.addf %38, %40 : vector<256x6xf32>
    %c0_49 = arith.constant 0 : index
    %c0_50 = arith.constant 0 : index
    %c0_51 = arith.constant 0 : index
    %42 = vector.load %arg4[%c0_49, %c0_50, %c0_51] : memref<1x256x6xf32, #tpu.memory_space<vmem>>, vector<1x256x6xf32>
    %43 = vector.shape_cast %42 : vector<1x256x6xf32> to vector<256x6xf32>
    %44 = vector.shape_cast %41 : vector<256x6xf32> to vector<1x256x6xf32>
    tpu.vector_store %arg4[%c0_49, %c0_50, %c0_51], %44 {strides = array<i32>} : memref<1x256x6xf32, #tpu.memory_space<vmem>>, vector<1x256x6xf32>,
    %cst_52 = arith.constant dense<0.000000e+00> : vector<6xf32>
    %45 = vector.multi_reduction <add>, %41, %cst_52 [0] : vector<256x6xf32> to vector<6xf32>
    %46 = vector.shape_cast %45 : vector<6xf32> to vector<1x6xf32>
    %c0_53 = arith.constant 0 : index
    %c0_54 = arith.constant 0 : index
    %c0_55 = arith.constant 0 : index
    %47 = vector.load %arg5[%c0_53, %c0_54, %c0_55] : memref<1x1x6xf32, #tpu.memory_space<vmem>>, vector<1x1x6xf32>
    %48 = vector.shape_cast %47 : vector<1x1x6xf32> to vector<1x6xf32>
    %49 = vector.shape_cast %46 : vector<1x6xf32> to vector<1x1x6xf32>
    tpu.vector_store %arg5[%c0_53, %c0_54, %c0_55], %49 {strides = array<i32>} : memref<1x1x6xf32, #tpu.memory_space<vmem>>, vector<1x1x6xf32>,
    %50 = arith.mulf %41, %41 : vector<256x6xf32>
    %cst_56 = arith.constant dense<0.000000e+00> : vector<6xf32>
    %51 = vector.multi_reduction <add>, %50, %cst_56 [0] : vector<256x6xf32> to vector<6xf32>
    %52 = vector.shape_cast %51 : vector<6xf32> to vector<1x6xf32>
    %c0_57 = arith.constant 0 : index
    %c0_58 = arith.constant 0 : index
    %c0_59 = arith.constant 0 : index
    %53 = vector.load %arg6[%c0_57, %c0_58, %c0_59] : memref<1x1x6xf32, #tpu.memory_space<vmem>>, vector<1x1x6xf32>
    %54 = vector.shape_cast %53 : vector<1x1x6xf32> to vector<1x6xf32>
    %55 = vector.shape_cast %52 : vector<1x6xf32> to vector<1x1x6xf32>
    tpu.vector_store %arg6[%c0_57, %c0_58, %c0_59], %55 {strides = array<i32>} : memref<1x1x6xf32, #tpu.memory_space<vmem>>, vector<1x1x6xf32>,
    return
  }
  func.func @transform_0(%arg0: i32) -> (i32, i32, i32, i32) {
    %c0_i32 = arith.constant 0 : i32
    %c0_i32_0 = arith.constant 0 : i32
    %c0_i32_1 = arith.constant 0 : i32
    %c0_i32_2 = arith.constant 0 : i32
    return %arg0, %c0_i32, %c0_i32_0, %c0_i32_1 : i32, i32, i32, i32
  }
  func.func @transform_1(%arg0: i32) -> (i32, i32) {
    %c0_i32 = arith.constant 0 : i32
    %c0_i32_0 = arith.constant 0 : i32
    %c0_i32_1 = arith.constant 0 : i32
    return %c0_i32, %c0_i32_0 : i32, i32
  }
  func.func @transform_2(%arg0: i32) -> (i32, i32) {
    %c0_i32 = arith.constant 0 : i32
    %c0_i32_0 = arith.constant 0 : i32
    %c0_i32_1 = arith.constant 0 : i32
    return %c0_i32, %c0_i32_0 : i32, i32
  }
  func.func @transform_3(%arg0: i32) -> (i32, i32, i32) {
    %c0_i32 = arith.constant 0 : i32
    %c0_i32_0 = arith.constant 0 : i32
    %c0_i32_1 = arith.constant 0 : i32
    return %arg0, %c0_i32, %c0_i32_0 : i32, i32, i32
  }
  func.func @transform_4(%arg0: i32) -> (i32, i32, i32) {
    %c0_i32 = arith.constant 0 : i32
    %c0_i32_0 = arith.constant 0 : i32
    %c0_i32_1 = arith.constant 0 : i32
    return %arg0, %c0_i32, %c0_i32_0 : i32, i32, i32
  }
  func.func @transform_5(%arg0: i32) -> (i32, i32, i32) {
    %c0_i32 = arith.constant 0 : i32
    %c0_i32_0 = arith.constant 0 : i32
    %c0_i32_1 = arith.constant 0 : i32
    return %arg0, %c0_i32, %c0_i32_0 : i32, i32, i32
  }
}

</mosaic_0001>

<bundles_post_ra>
// kernel: tpu_custom_call.1
= control target key start
LH: loop header
LB: loop body
LE: loop exit
PB: predicated region body
PF: predicated region fallthrough
CT: control target
= control target key end

     0   :  { %11 = vsyncpa [#allocation4], 0  ;;  %s4428_s0 = inlined_call_operand.vmem [shape: f32[2,18,18,4], index: 0, kind: input, shape index: {}]   ;;  %s4429_s1 = inlined_call_operand.vmem [shape: f32[36,6], index: 1, kind: input, shape index: {}]   ;;  %s4430_s2 = inlined_call_operand.vmem [shape: f32[1,6], index: 2, kind: input, shape index: {}]   ;;  %s4431_s3 = inlined_call_operand.vmem [shape: f32[2,256,6], index: 3, kind: output, shape index: {0}]   ;;  %s4432_s4 = inlined_call_operand.hbm [shape: f32[2,1,6], index: 4, kind: output, shape index: {1}]   ;;  %s4433_s5 = inlined_call_operand.hbm [shape: f32[2,1,6], index: 5, kind: output, shape index: {2}]  }
   0x1   :  { %13 = vsyncpa [#allocation4 + $0x1], 0 }
   0x2   :  { %14 = vsyncpa [#allocation6], 0 }
   0x3   :  { %16 = vsyncpa [#allocation6 + $0x1], 0  ;;  %s3113_s18 = smov 0   ;;  %s3115_s19 = smov 0  }
   0x4   :  { %s3117_s20 = smov 0   ;;  %s3119_s21 = smov 0  }
   0x5 LB: > { %s3134_s22 = sadd.s32 4294967295, %s3071_s21   ;;  %s2577_s23 = sadd.s32 4294967294, %s3071_s21   ;;  %s3071_s21 = sphi %s3119_s21, %s4439_s21   ;;  %s3067_s20 = sphi %s3117_s20, %s4438_s20   ;;  %s3063_s19 = sphi %s3115_s19, %s4437_s19   ;;  %s3059_s18 = sphi %s3113_s18, %s4436_s18  }
   0x6   : > { %s3138_s24 = sadd.s32 1, %s3071_s21   ;;  %s123_s25 = sadd.s32 1, %s3067_s20 }
   0x7   : > { %s120_s26 = ssub.s32 %s3071_s21, %s3138_s24  ;;  %p133_p0 = scmp.ne.s32.totalorder %s3067_s20, %s3063_s19 }
   0x8   : > { %p121_p1 = scmp.eq.s32.totalorder %s120_s26, 0  ;;  %p134_p2 = scmp.eq.s32.totalorder %s3134_s22, 1 }
   0x9   : > { %p139_p3 = scmp.ne.s32.totalorder %s3063_s19, %s3059_s18  ;;  %p140_p4 = scmp.eq.s32.totalorder %s2577_s23, 1 }
   0xa   : > { %s3149_s27 = scalar_select %p121_p1, %s3067_s20, %s123_s25  }
   0xb   : > { %p3151_p5 = por %p134_p2, %p133_p0  ;;  %p3155_p6 = por %p140_p4, %p139_p3 }
   0xc   : > { %p2580_p7 = scmp.ge.s32.totalorder %s3071_s21, 1  ;;  %p198_p8 = scmp.lt.s32.totalorder %s3071_s21, 3 }
   0xe   : > { %p199_p9 = pnand %p2580_p7, %p198_p8 }
   0xf   : > { %p234_p10 = scmp.lt.s32.totalorder (!%p199_p9), %s3134_s22, 1  ;;  %s3073_s10 = smov (!%p199_p9), 4   ;;  %vm276_vm0 = vcmask (!%p199_p9), 31744   ;;  %vm469_vm1 = vcmask (!%p199_p9), 64544   ;;  %vm1996_vm2 = vcmask (!%p199_p9), 1043456   ;;  %vm662_vm3 = vcmask (!%p199_p9), 97344  }
  0x10   : > { %202 = sbr.rel (%p199_p9) target bundleno = 930 (0x3a2), region = 32  ;;  %s3074_s11 = smov (!%p199_p9), 8   ;;  %vm856_vm4 = vcmask (!%p199_p9), 130144   ;;  %vm1049_vm5 = vcmask (!%p199_p9), 162944   ;;  %vm1242_vm6 = vcmask (!%p199_p9), 195744   ;;  %vm1436_vm7 = vcmask (!%p199_p9), 228544  }
  0x11   : > { %s3075_s12 = smov (!%p199_p9), 12   ;;  %s3076_s13 = smov (!%p199_p9), 16   ;;  %vm1629_vm8 = vcmask (!%p199_p9), 261344   ;;  %vm1822_vm9 = vcmask (!%p199_p9), 294144   ;;  %vm1899_vm10 = vcmask (!%p199_p9), 293888   ;;  %vm2225_vm11 = vcmask (!%p199_p9), 48128  }
  0x12   : > { %s3077_s14 = smov (!%p199_p9), 20   ;;  %s3078_s25 = smov (!%p199_p9), 24   ;;  %vm2327_vm12 = vcmask (!%p199_p9), 40960  }
  0x13   : > { %s3080_s16 = smov (!%p199_p9), 32  }
  0x17   : > { %s3163_s30 = scalar_select %p234_p10, %s3134_s22, 1 }
  0x19   : > { %s2924_s6 = smul.u32 432, %s3163_s30 }
  0x1b   : > { %s3169_s9 = scalar_lea.vmem %s4428_s0, %s2924_s6 }
  0x1c   : > { %v3172_v0 = vld [vmem:[%s3169_s9 + $0x19] sm:$0xff]  ;;  %v309_v1 = vld [vmem:[%s3169_s9 + $0x1] sm:$0xff]  ;;  %v310_v3 = vld [vmem:[%s3169_s9 + $0x9] sm:$0xff] }
  0x1d   : > { %377 = vrot.lane.b32.xlu1 %v3172_v0, %s3073_s10  ;;  %373 = vrot.lane.b32.xlu0 %v309_v1, %s3073_s10  ;;  %v3179_v2 = vld [vmem:[%s3169_s9 + $0x21] sm:$0xff]  ;;  %v3186_v4 = vld [vmem:[%s3169_s9 + $0x39] sm:$0xff] }
  0x1e   : > { %v3189_v5 = vld [vmem:[%s3169_s9 + $0x31] sm:$0xff]  ;;  %v3199_v7 = vld [vmem:[%s3169_s9 + $0x49] sm:$0xff]  ;;  %v3209_v9 = vld [vmem:[%s3169_s9 + $0x61] sm:$0xff] }
  0x1f   : > { %v3196_v6 = vld [vmem:[%s3169_s9 + $0x51] sm:$0xff]  ;;  %v3206_v8 = vld [vmem:[%s3169_s9 + $0x69] sm:$0xff]  ;;  %v3216_v10 = vld [vmem:[%s3169_s9 + $0x81] sm:$0xff] }
  0x20   : > { %v3219_v11 = vld [vmem:[%s3169_s9 + $0x79] sm:$0xff]  ;;  %v3233_v15 = vld [vmem:[%s3169_s9 + $0x91] sm:$0xff]  ;;  %v245_v17 = vld [vmem:[%s3169_s9 + $0x8] sm:$0xff] }
  0x21   : > { %379 = vrot.lane.b32.xlu1 %v3179_v2, %s3073_s10  ;;  %375 = vrot.lane.b32.xlu0 %v310_v3, %s3073_s10  ;;  %v3226_v12 = vld [vmem:[%s3169_s9 + $0x18] sm:$0xff]  ;;  %v244_v13 = vld [vmem:[%s3169_s9] sm:$0xff]  ;;  %278 = vst.msk [vmem:[#allocation2 + $0x8] sm:$0xff] %vm276_vm0, %v245_v17 }
  0x22   : > { %v3230_v14 = vld [vmem:[%s3169_s9 + $0x99] sm:$0xff]  ;;  %279 = vst.msk [vmem:[#allocation2 + $0x10] sm:$0xff] %vm276_vm0, %v3226_v12  ;;  %277 = vst.msk [vmem:[#allocation2] sm:$0xff] %vm276_vm0, %v244_v13  ;;  %v3245_v18 = vld [vmem:[%s3169_s9 + $0xb1] sm:$0xff] }
  0x23   : > { %v3239_v16 = vld [vmem:[%s3169_s9 + $0x20] sm:$0xff]  ;;  %v3249_v19 = vld [vmem:[%s3169_s9 + $0x38] sm:$0xff]  ;;  %v3252_v20 = vld [vmem:[%s3169_s9 + $0x30] sm:$0xff] }
  0x24   : > { %280 = vst.msk [vmem:[#allocation2 + $0x18] sm:$0xff] %vm276_vm0, %v3239_v16  ;;  %v3259_v21 = vld [vmem:[%s3169_s9 + $0xa9] sm:$0xff]  ;;  %282 = vst.msk [vmem:[#allocation2 + $0x28] sm:$0xff] %vm276_vm0, %v3249_v19  ;;  %v3277_v25 = vld [vmem:[%s3169_s9 + $0x60] sm:$0xff] }
  0x25   : > { %383 = vrot.lane.b32.xlu1 %v3186_v4, %s3073_s10  ;;  %381 = vrot.lane.b32.xlu0 %v3189_v5, %s3073_s10  ;;  %281 = vst.msk [vmem:[#allocation2 + $0x20] sm:$0xff] %vm276_vm0, %v3252_v20  ;;  %v3266_v22 = vld [vmem:[%s3169_s9 + $0x50] sm:$0xff]  ;;  %v3271_v23 = vld [vmem:[%s3169_s9 + $0x48] sm:$0xff]  ;;  %285 = vst.msk [vmem:[#allocation2 + $0x40] sm:$0xff] %vm276_vm0, %v3277_v25 }
  0x26   : > { %284 = vst.msk [vmem:[#allocation2 + $0x38] sm:$0xff] %vm276_vm0, %v3266_v22  ;;  %v3274_v24 = vld [vmem:[%s3169_s9 + $0x68] sm:$0xff]  ;;  %283 = vst.msk [vmem:[#allocation2 + $0x30] sm:$0xff] %vm276_vm0, %v3271_v23  ;;  %v3286_v26 = vld [vmem:[%s3169_s9 + $0x80] sm:$0xff] }
  0x27   : > { %286 = vst.msk [vmem:[#allocation2 + $0x48] sm:$0xff] %vm276_vm0, %v3274_v24  ;;  %v3289_v27 = vld [vmem:[%s3169_s9 + $0x78] sm:$0xff]  ;;  %v326_v29 = vld [vmem:[%s3169_s9 + $0xc9] sm:$0xff]  ;;  %v325_v30 = vld [vmem:[%s3169_s9 + $0xc1] sm:$0xff] }
  0x28   : > { %v3292_v28 = vld [vmem:[%s3169_s9 + $0x98] sm:$0xff]  ;;  %288 = vst.msk [vmem:[#allocation2 + $0x58] sm:$0xff] %vm276_vm0, %v3286_v26  ;;  %287 = vst.msk [vmem:[#allocation2 + $0x50] sm:$0xff] %vm276_vm0, %v3289_v27  ;;  %v3303_v31 = vld [vmem:[%s3169_s9 + $0x90] sm:$0xff] }
  0x29   : > { %387 = vrot.lane.b32.xlu1 %v3196_v6, %s3073_s10  ;;  %385 = vrot.lane.b32.xlu0 %v3199_v7, %s3073_s10  ;;  %290 = vst.msk [vmem:[#allocation2 + $0x68] sm:$0xff] %vm276_vm0, %v3292_v28  ;;  %v3306_v32 = vld [vmem:[%s3169_s9 + $0xb0] sm:$0xff]  ;;  %v3309_v33 = vld [vmem:[%s3169_s9 + $0xa8] sm:$0xff]  ;;  %289 = vst.msk [vmem:[#allocation2 + $0x60] sm:$0xff] %vm276_vm0, %v3303_v31 }
  0x2a   : > { %292 = vst.msk [vmem:[#allocation2 + $0x78] sm:$0xff] %vm276_vm0, %v3306_v32  ;;  %291 = vst.msk [vmem:[#allocation2 + $0x70] sm:$0xff] %vm276_vm0, %v3309_v33  ;;  %v3322_v34 = vld [vmem:[%s3169_s9 + $0xc8] sm:$0xff]  ;;  %v3325_v35 = vld [vmem:[%s3169_s9 + $0xc0] sm:$0xff] }
  0x2b   : > { %294 = vst.msk [vmem:[#allocation2 + $0x88] sm:$0xff] %vm276_vm0, %v3322_v34  ;;  %293 = vst.msk [vmem:[#allocation2 + $0x80] sm:$0xff] %vm276_vm0, %v3325_v35  ;;  %v3332_v36 = vld [vmem:[%s3169_s9 + $0xe0] sm:$0xff]  ;;  %v3335_v37 = vld [vmem:[%s3169_s9 + $0xd8] sm:$0xff] }
  0x2c   : > { %v3338_v38 = vld [vmem:[%s3169_s9 + $0xf8] sm:$0xff]  ;;  %296 = vst.msk [vmem:[#allocation2 + $0x98] sm:$0xff] %vm276_vm0, %v3332_v36  ;;  %295 = vst.msk [vmem:[#allocation2 + $0x90] sm:$0xff] %vm276_vm0, %v3335_v37  ;;  %v3347_v39 = vld [vmem:[%s3169_s9 + $0xf0] sm:$0xff] }
  0x2d   : > { %391 = vrot.lane.b32.xlu1 %v3206_v8, %s3073_s10  ;;  %389 = vrot.lane.b32.xlu0 %v3209_v9, %s3073_s10  ;;  %298 = vst.msk [vmem:[#allocation2 + $0xa8] sm:$0xff] %vm276_vm0, %v3338_v38  ;;  %v3350_v40 = vld [vmem:[%s3169_s9 + $0x110] sm:$0xff]  ;;  %v3353_v41 = vld [vmem:[%s3169_s9 + $0x108] sm:$0xff]  ;;  %297 = vst.msk [vmem:[#allocation2 + $0xa0] sm:$0xff] %vm276_vm0, %v3347_v39 }
  0x2e   : > { %300 = vst.msk [vmem:[#allocation2 + $0xb8] sm:$0xff] %vm276_vm0, %v3350_v40  ;;  %299 = vst.msk [vmem:[#allocation2 + $0xb0] sm:$0xff] %vm276_vm0, %v3353_v41  ;;  %v328_v42 = vld [vmem:[%s3169_s9 + $0xe1] sm:$0xff]  ;;  %v327_v43 = vld [vmem:[%s3169_s9 + $0xd9] sm:$0xff] }
  0x2f   : > { %v3366_v44 = vld [vmem:[%s3169_s9 + $0x120] sm:$0xff]  ;;  %v3369_v45 = vld [vmem:[%s3169_s9 + $0x128] sm:$0xff]  ;;  %v329_v47 = vld [vmem:[%s3169_s9 + $0xf1] sm:$0xff] }
  0x30   : > { %301 = vst.msk [vmem:[#allocation2 + $0xc0] sm:$0xff] %vm276_vm0, %v3366_v44  ;;  %302 = vst.msk [vmem:[#allocation2 + $0xc8] sm:$0xff] %vm276_vm0, %v3369_v45  ;;  %v330_v46 = vld [vmem:[%s3169_s9 + $0xf9] sm:$0xff]  ;;  %v332_v50 = vld [vmem:[%s3169_s9 + $0x111] sm:$0xff] }
  0x31   : > { %395 = vrot.lane.b32.xlu1 %v3216_v10, %s3073_s10  ;;  %393 = vrot.lane.b32.xlu0 %v3219_v11, %s3073_s10  ;;  %v270_v48 = vld [vmem:[%s3169_s9 + $0x138] sm:$0xff]  ;;  %v271_v49 = vld [vmem:[%s3169_s9 + $0x140] sm:$0xff] }
  0x32   : > { %303 = vst.msk [vmem:[#allocation2 + $0xd0] sm:$0xff] %vm276_vm0, %v270_v48  ;;  %304 = vst.msk [vmem:[#allocation2 + $0xd8] sm:$0xff] %vm276_vm0, %v271_v49  ;;  %v331_v51 = vld [vmem:[%s3169_s9 + $0x109] sm:$0xff]  ;;  %v273_v53 = vld [vmem:[%s3169_s9 + $0x158] sm:$0xff] }
  0x33   : > { %v272_v52 = vld [vmem:[%s3169_s9 + $0x150] sm:$0xff]  ;;  %306 = vst.msk [vmem:[#allocation2 + $0xe8] sm:$0xff] %vm276_vm0, %v273_v53  ;;  %v333_v55 = vld [vmem:[%s3169_s9 + $0x121] sm:$0xff]  ;;  %v335_v59 = vld [vmem:[%s3169_s9 + $0x139] sm:$0xff] }
  0x34   : > { %305 = vst.msk [vmem:[#allocation2 + $0xe0] sm:$0xff] %vm276_vm0, %v272_v52  ;;  %v334_v54 = vld [vmem:[%s3169_s9 + $0x129] sm:$0xff]  ;;  %v336_v58 = vld [vmem:[%s3169_s9 + $0x141] sm:$0xff]  ;;  %v338_v60 = vld [vmem:[%s3169_s9 + $0x159] sm:$0xff] }
  0x35   : > { %399 = vrot.lane.b32.xlu1 %v3230_v14, %s3073_s10  ;;  %397 = vrot.lane.b32.xlu0 %v3233_v15, %s3073_s10  ;;  %v274_v56 = vld [vmem:[%s3169_s9 + $0x168] sm:$0xff]  ;;  %v275_v57 = vld [vmem:[%s3169_s9 + $0x170] sm:$0xff] }
  0x36   : > { %307 = vst.msk [vmem:[#allocation2 + $0xf0] sm:$0xff] %vm276_vm0, %v274_v56  ;;  %308 = vst.msk [vmem:[#allocation2 + $0xf8] sm:$0xff] %vm276_vm0, %v275_v57  ;;  %v337_v61 = vld [vmem:[%s3169_s9 + $0x151] sm:$0xff]  ;;  %v339_v63 = vld [vmem:[%s3169_s9 + $0x169] sm:$0xff] }
  0x37   : > { %v340_v62 = vld [vmem:[%s3169_s9 + $0x171] sm:$0xff]  ;;  %v502_v3 = vld [vmem:[%s3169_s9 + $0x2] sm:$0xff]  ;;  %v3421_v17 = vld [vmem:[%s3169_s9 + $0x1a] sm:$0xff] }
  0x38   : > { %v503_v1 = vld [vmem:[%s3169_s9 + $0xa] sm:$0xff]  ;;  %v3418_v13 = vld [vmem:[%s3169_s9 + $0x22] sm:$0xff]  ;;  %v3461_v49 = vld [vmem:[%s3169_s9 + $0x7a] sm:$0xff] }
  0x39   : > { %403 = vrot.lane.b32.xlu1 %v3245_v18, %s3073_s10  ;;  %401 = vrot.lane.b32.xlu0 %v3259_v21, %s3073_s10  ;;  %v3458_v48 = vld [vmem:[%s3169_s9 + $0x82] sm:$0xff]  ;;  %v3478_v52 = vld [vmem:[%s3169_s9 + $0xb2] sm:$0xff] }
  0x3a   : > { %v3481_v53 = vld [vmem:[%s3169_s9 + $0xaa] sm:$0xff]  ;;  %v521_v56 = vld [vmem:[%s3169_s9 + $0xe2] sm:$0xff]  ;;  %v520_v57 = vld [vmem:[%s3169_s9 + $0xda] sm:$0xff] }
  0x3d   : > { %407 = vrot.lane.b32.xlu1 %v326_v29, %s3073_s10  ;;  %405 = vrot.lane.b32.xlu0 %v325_v30, %s3073_s10  ;;  %v3428_v29 = vld [vmem:[%s3169_s9 + $0x3a] sm:$0xff]  ;;  %v3431_v30 = vld [vmem:[%s3169_s9 + $0x32] sm:$0xff] }
  0x41   : > { %411 = vrot.lane.b32.xlu1 %v328_v42, %s3073_s10  ;;  %409 = vrot.lane.b32.xlu0 %v327_v43, %s3073_s10  ;;  %v3438_v42 = vld [vmem:[%s3169_s9 + $0x52] sm:$0xff]  ;;  %v3441_v43 = vld [vmem:[%s3169_s9 + $0x4a] sm:$0xff] }
  0x45   : > { %415 = vrot.lane.b32.xlu1 %v330_v46, %s3073_s10  ;;  %413 = vrot.lane.b32.xlu0 %v329_v47, %s3073_s10  ;;  %v3448_v46 = vld [vmem:[%s3169_s9 + $0x6a] sm:$0xff]  ;;  %v3451_v47 = vld [vmem:[%s3169_s9 + $0x62] sm:$0xff] }
  0x49   : > { %419 = vrot.lane.b32.xlu1 %v332_v50, %s3073_s10  ;;  %417 = vrot.lane.b32.xlu0 %v331_v51, %s3073_s10  ;;  %v3468_v50 = vld [vmem:[%s3169_s9 + $0x9a] sm:$0xff]  ;;  %v3471_v51 = vld [vmem:[%s3169_s9 + $0x92] sm:$0xff] }
  0x4d   : > { %423 = vrot.lane.b32.xlu1 %v334_v54, %s3073_s10  ;;  %421 = vrot.lane.b32.xlu0 %v333_v55, %s3073_s10  ;;  %v3488_v54 = vld [vmem:[%s3169_s9 + $0xca] sm:$0xff]  ;;  %v3491_v55 = vld [vmem:[%s3169_s9 + $0xc2] sm:$0xff] }
  0x51   : > { %427 = vrot.lane.b32.xlu1 %v336_v58, %s3073_s10  ;;  %425 = vrot.lane.b32.xlu0 %v335_v59, %s3073_s10  ;;  %v523_v58 = vld [vmem:[%s3169_s9 + $0xfa] sm:$0xff]  ;;  %v522_v59 = vld [vmem:[%s3169_s9 + $0xf2] sm:$0xff] }
  0x55   : > { %431 = vrot.lane.b32.xlu1 %v338_v60, %s3073_s10  ;;  %429 = vrot.lane.b32.xlu0 %v337_v61, %s3073_s10  ;;  %v525_v60 = vld [vmem:[%s3169_s9 + $0x112] sm:$0xff]  ;;  %v524_v61 = vld [vmem:[%s3169_s9 + $0x10a] sm:$0xff] }
  0x59   : > { %435 = vrot.lane.b32.xlu1 %v340_v62, %s3073_s10  ;;  %433 = vrot.lane.b32.xlu0 %v339_v63, %s3073_s10  ;;  %v527_v62 = vld [vmem:[%s3169_s9 + $0x12a] sm:$0xff]  ;;  %v526_v63 = vld [vmem:[%s3169_s9 + $0x122] sm:$0xff]  ;;  %s3079_s10 = smov 28  }
  0x5d   : > { %568 = vrot.lane.b32.xlu1 %v503_v1, %s3074_s11  ;;  %566 = vrot.lane.b32.xlu0 %v502_v3, %s3074_s11  ;;  %v529_v1 = vld [vmem:[%s3169_s9 + $0x142] sm:$0xff]  ;;  %v528_v3 = vld [vmem:[%s3169_s9 + $0x13a] sm:$0xff] }
  0x61   : > { %572 = vrot.lane.b32.xlu1 %v3418_v13, %s3074_s11  ;;  %570 = vrot.lane.b32.xlu0 %v3421_v17, %s3074_s11 }
  0x65   : > { %576 = vrot.lane.b32.xlu1 %v3428_v29, %s3074_s11  ;;  %574 = vrot.lane.b32.xlu0 %v3431_v30, %s3074_s11 }
  0x69   : > { %580 = vrot.lane.b32.xlu1 %v3438_v42, %s3074_s11  ;;  %578 = vrot.lane.b32.xlu0 %v3441_v43, %s3074_s11 }
  0x6d   : > { %584 = vrot.lane.b32.xlu1 %v3448_v46, %s3074_s11  ;;  %582 = vrot.lane.b32.xlu0 %v3451_v47, %s3074_s11 }
  0x71   : > { %588 = vrot.lane.b32.xlu1 %v3458_v48, %s3074_s11  ;;  %586 = vrot.lane.b32.xlu0 %v3461_v49, %s3074_s11 }
  0x75   : > { %592 = vrot.lane.b32.xlu1 %v3468_v50, %s3074_s11  ;;  %590 = vrot.lane.b32.xlu0 %v3471_v51, %s3074_s11 }
  0x79   : > { %596 = vrot.lane.b32.xlu1 %v3478_v52, %s3074_s11  ;;  %594 = vrot.lane.b32.xlu0 %v3481_v53, %s3074_s11 }
  0x7d   : > { %600 = vrot.lane.b32.xlu1 %v3488_v54, %s3074_s11  ;;  %598 = vrot.lane.b32.xlu0 %v3491_v55, %s3074_s11 }
  0x81   : > { %604 = vrot.lane.b32.xlu1 %v521_v56, %s3074_s11  ;;  %602 = vrot.lane.b32.xlu0 %v520_v57, %s3074_s11 }
  0x85   : > { %608 = vrot.lane.b32.xlu1 %v523_v58, %s3074_s11  ;;  %606 = vrot.lane.b32.xlu0 %v522_v59, %s3074_s11  ;;  %v531_v58 = vld [vmem:[%s3169_s9 + $0x15a] sm:$0xff]  ;;  %v530_v59 = vld [vmem:[%s3169_s9 + $0x152] sm:$0xff] }
  0x89   : > { %612 = vrot.lane.b32.xlu1 %v525_v60, %s3074_s11  ;;  %610 = vrot.lane.b32.xlu0 %v524_v61, %s3074_s11 }
  0x8d   : > { %616 = vrot.lane.b32.xlu1 %v527_v62, %s3074_s11  ;;  %614 = vrot.lane.b32.xlu0 %v526_v63, %s3074_s11  ;;  %v533_v62 = vld [vmem:[%s3169_s9 + $0x172] sm:$0xff]  ;;  %v532_v63 = vld [vmem:[%s3169_s9 + $0x16a] sm:$0xff] }
  0x8f   : > { %v378_v56 = vpop.permute.xlu1 %377  ;;  %v374_v57 = vpop.permute.xlu0 %373 }
  0x90   : > { %472 = vst.msk [vmem:[#allocation2 + $0x10] sm:$0xff] %vm469_vm1, %v378_v56  ;;  %470 = vst.msk [vmem:[#allocation2] sm:$0xff] %vm469_vm1, %v374_v57 }
  0x91   : > { %620 = vrot.lane.b32.xlu1 %v529_v1, %s3074_s11  ;;  %618 = vrot.lane.b32.xlu0 %v528_v3, %s3074_s11 }
  0x93   : > { %v380_v60 = vpop.permute.xlu1 %379  ;;  %v376_v61 = vpop.permute.xlu0 %375 }
  0x94   : > { %473 = vst.msk [vmem:[#allocation2 + $0x18] sm:$0xff] %vm469_vm1, %v380_v60  ;;  %471 = vst.msk [vmem:[#allocation2 + $0x8] sm:$0xff] %vm469_vm1, %v376_v61 }
  0x95   : > { %624 = vrot.lane.b32.xlu1 %v531_v58, %s3074_s11  ;;  %622 = vrot.lane.b32.xlu0 %v530_v59, %s3074_s11 }
  0x97   : > { %v384_v56 = vpop.permute.xlu1 %383  ;;  %v382_v57 = vpop.permute.xlu0 %381 }
  0x98   : > { %475 = vst.msk [vmem:[#allocation2 + $0x28] sm:$0xff] %vm469_vm1, %v384_v56  ;;  %474 = vst.msk [vmem:[#allocation2 + $0x20] sm:$0xff] %vm469_vm1, %v382_v57 }
  0x99   : > { %628 = vrot.lane.b32.xlu1 %v533_v62, %s3074_s11  ;;  %626 = vrot.lane.b32.xlu0 %v532_v63, %s3074_s11 }
  0x9b   : > { %v388_v1 = vpop.permute.xlu1 %387  ;;  %v386_v3 = vpop.permute.xlu0 %385 }
  0x9c   : > { %477 = vst.msk [vmem:[#allocation2 + $0x38] sm:$0xff] %vm469_vm1, %v388_v1  ;;  %476 = vst.msk [vmem:[#allocation2 + $0x30] sm:$0xff] %vm469_vm1, %v386_v3 }
  0x9d   : > { %762 = vrot.lane.b32.xlu1 %v3239_v16, %s3075_s12  ;;  %760 = vrot.lane.b32.xlu0 %v3226_v12, %s3075_s12 }
  0x9f   : > { %v392_v58 = vpop.permute.xlu1 %391  ;;  %v390_v59 = vpop.permute.xlu0 %389 }
  0xa0   : > { %479 = vst.msk [vmem:[#allocation2 + $0x48] sm:$0xff] %vm469_vm1, %v392_v58  ;;  %478 = vst.msk [vmem:[#allocation2 + $0x40] sm:$0xff] %vm469_vm1, %v390_v59  ;;  %v1888_v58 = vld [vmem:[%s4429_s1 + $0x8] sm:$0xff] }
  0xa1   : > { %766 = vrot.lane.b32.xlu1 %v3249_v19, %s3075_s12  ;;  %764 = vrot.lane.b32.xlu0 %v3252_v20, %s3075_s12 }
  0xa3   : > { %v396_v60 = vpop.permute.xlu1 %395  ;;  %v394_v61 = vpop.permute.xlu0 %393 }
  0xa4   : > { %481 = vst.msk [vmem:[#allocation2 + $0x58] sm:$0xff] %vm469_vm1, %v396_v60  ;;  %480 = vst.msk [vmem:[#allocation2 + $0x50] sm:$0xff] %vm469_vm1, %v394_v61  ;;  %v1889_v60 = vld [vmem:[%s4429_s1 + $0x10] sm:$0xff]  ;;  %v1890_v61 = vld [vmem:[%s4429_s1 + $0x18] sm:$0xff] }
  0xa5   : > { %770 = vrot.lane.b32.xlu1 %v3266_v22, %s3075_s12  ;;  %768 = vrot.lane.b32.xlu0 %v3271_v23, %s3075_s12 }
  0xa7   : > { %v400_v12 = vpop.permute.xlu1 %399  ;;  %v398_v16 = vpop.permute.xlu0 %397 }
  0xa8   : > { %483 = vst.msk [vmem:[#allocation2 + $0x68] sm:$0xff] %vm469_vm1, %v400_v12  ;;  %482 = vst.msk [vmem:[#allocation2 + $0x60] sm:$0xff] %vm469_vm1, %v398_v16 }
  0xa9   : > { %774 = vrot.lane.b32.xlu1 %v3274_v24, %s3075_s12  ;;  %772 = vrot.lane.b32.xlu0 %v3277_v25, %s3075_s12 }
  0xab   : > { %v404_v62 = vpop.permute.xlu1 %403  ;;  %v402_v63 = vpop.permute.xlu0 %401 }
  0xac   : > { %485 = vst.msk [vmem:[#allocation2 + $0x78] sm:$0xff] %vm469_vm1, %v404_v62  ;;  %484 = vst.msk [vmem:[#allocation2 + $0x70] sm:$0xff] %vm469_vm1, %v402_v63 }
  0xad   : > { %953 = vrot.lane.b32.xlu1 %v3172_v0, %s3076_s13  ;;  %776 = vrot.lane.b32.xlu0 %v3289_v27, %s3075_s12  ;;  %v1887_v0 = vld [vmem:[%s4429_s1] sm:$0xff] }
  0xae   : > { %v2910_v59 = vpack.c.bf16 %v1888_v58, %v1887_v0 }
  0xaf   : > { %v408_v56 = vpop.permute.xlu1 %407  ;;  %v406_v57 = vpop.permute.xlu0 %405 }
  0xb0   : > { %487 = vst.msk [vmem:[#allocation2 + $0x88] sm:$0xff] %vm469_vm1, %v408_v56  ;;  %486 = vst.msk [vmem:[#allocation2 + $0x80] sm:$0xff] %vm469_vm1, %v406_v57  ;;  %2911 = vmatprep.subr.bf16.mxu0 %v2910_v59  ;;  %2918 = vmatprep.subr.bf16.mxu1 %v2910_v59 }
  0xb1   : > { %1146 = vrot.lane.b32.xlu1 %v3421_v17, %s3077_s14  ;;  %955 = vrot.lane.b32.xlu0 %v3179_v2, %s3076_s13 }
  0xb2   : > { %2913 = vmatpush3.bf16.msra.mxu0 %v2910_v59  ;;  %2921 = vmatpush3.bf16.msra.mxu1 %v2910_v59 }
  0xb3   : > { %v412_v1 = vpop.permute.xlu1 %411  ;;  %v410_v3 = vpop.permute.xlu0 %409 }
  0xb4   : > { %489 = vst.msk [vmem:[#allocation2 + $0x98] sm:$0xff] %vm469_vm1, %v412_v1  ;;  %488 = vst.msk [vmem:[#allocation2 + $0x90] sm:$0xff] %vm469_vm1, %v410_v3 }
  0xb5   : > { %1340 = vrot.lane.b32.xlu1 %v3252_v20, %s3078_s25  ;;  %1148 = vrot.lane.b32.xlu0 %v3418_v13, %s3077_s14  ;;  %v2914_v20 = vpack.c.bf16 %v1890_v61, %v1889_v60 }
  0xb7   : > { %v416_v2 = vpop.permute.xlu1 %415  ;;  %v414_v17 = vpop.permute.xlu0 %413  ;;  %2915 = vmatprep.subr.bf16.mxu0 %v2914_v20  ;;  %2919 = vmatprep.subr.bf16.mxu1 %v2914_v20 }
  0xb8   : > { %491 = vst.msk [vmem:[#allocation2 + $0xa8] sm:$0xff] %vm469_vm1, %v416_v2  ;;  %490 = vst.msk [vmem:[#allocation2 + $0xa0] sm:$0xff] %vm469_vm1, %v414_v17  ;;  %2917 = vmatpush3.bf16.msra.mxu0 %v2914_v20  ;;  %2922 = vmatpush3.bf16.msra.mxu1 %v2914_v20 }
  0xb9   : > { %1533 = vrot.lane.b32.xlu1 %v3189_v5, %s3079_s10  ;;  %1342 = vrot.lane.b32.xlu0 %v3249_v19, %s3078_s25  ;;  %v1891_v19 = vld [vmem:[%s4429_s1 + $0x20] sm:$0xf] }
  0xba   : > { %2860 = vmatprep.subr.msk.mxu0 %vm1996_vm2, %v1891_v19  ;;  %2920 = vmatprep.subr.msk.mxu1 %vm1996_vm2, %v1891_v19 }
  0xbb   : > { %v420_v13 = vpop.permute.xlu1 %419  ;;  %v418_v12 = vpop.permute.xlu0 %417 }
  0xbc   : > { %493 = vst.msk [vmem:[#allocation2 + $0xb8] sm:$0xff] %vm469_vm1, %v420_v13  ;;  %492 = vst.msk [vmem:[#allocation2 + $0xb0] sm:$0xff] %vm469_vm1, %v418_v12  ;;  %2861 = vmatpush3.msk.msra.mxu0 %vm1996_vm2, %v1891_v19  ;;  %2923 = vmatpush3.msk.msra.mxu1 %vm1996_vm2, %v1891_v19 }
  0xbd   : > { %1535 = vrot.lane.b32.xlu1 %v3186_v4, %s3079_s10  ;;  %957 = vrot.lane.b32.xlu0 %v3189_v5, %s3076_s13 }
  0xbf   : > { %v424_v16 = vpop.permute.xlu1 %423  ;;  %v422_v62 = vpop.permute.xlu0 %421 }
  0xc0   : > { %495 = vst.msk [vmem:[#allocation2 + $0xc8] sm:$0xff] %vm469_vm1, %v424_v16  ;;  %494 = vst.msk [vmem:[#allocation2 + $0xc0] sm:$0xff] %vm469_vm1, %v422_v62 }
  0xc1   : > { %959 = vrot.lane.b32.xlu1 %v3186_v4, %s3076_s13  ;;  %1726 = vrot.lane.b32.xlu0 %v3431_v30, %s3080_s16 }
  0xc3   : > { %v428_v5 = vpop.permute.xlu1 %427  ;;  %v426_v63 = vpop.permute.xlu0 %425 }
  0xc4   : > { %497 = vst.msk [vmem:[#allocation2 + $0xd8] sm:$0xff] %vm469_vm1, %v428_v5  ;;  %496 = vst.msk [vmem:[#allocation2 + $0xd0] sm:$0xff] %vm469_vm1, %v426_v63 }
  0xc5   : > { %1728 = vrot.lane.b32.xlu1 %v3428_v29, %s3080_s16  ;;  %1150 = vrot.lane.b32.xlu0 %v3431_v30, %s3077_s14 }
  0xc7   : > { %v432_v56 = vpop.permute.xlu1 %431  ;;  %v430_v57 = vpop.permute.xlu0 %429 }
  0xc8   : > { %499 = vst.msk [vmem:[#allocation2 + $0xe8] sm:$0xff] %vm469_vm1, %v432_v56  ;;  %498 = vst.msk [vmem:[#allocation2 + $0xe0] sm:$0xff] %vm469_vm1, %v430_v57 }
  0xc9   : > { %1344 = vrot.lane.b32.xlu1 %v3271_v23, %s3078_s25  ;;  %1152 = vrot.lane.b32.xlu0 %v3428_v29, %s3077_s14 }
  0xcb   : > { %v436_v4 = vpop.permute.xlu1 %435  ;;  %v434_v1 = vpop.permute.xlu0 %433 }
  0xcc   : > { %501 = vst.msk [vmem:[#allocation2 + $0xf8] sm:$0xff] %vm469_vm1, %v436_v4  ;;  %500 = vst.msk [vmem:[#allocation2 + $0xf0] sm:$0xff] %vm469_vm1, %v434_v1 }
  0xcd   : > { %1537 = vrot.lane.b32.xlu1 %v3199_v7, %s3079_s10  ;;  %1346 = vrot.lane.b32.xlu0 %v3266_v22, %s3078_s25 }
  0xcf   : > { %v569_v30 = vpop.permute.xlu1 %568  ;;  %v567_v3 = vpop.permute.xlu0 %566 }
  0xd0   : > { %664 = vst.msk [vmem:[#allocation2 + $0x8] sm:$0xff] %vm662_vm3, %v569_v30  ;;  %663 = vst.msk [vmem:[#allocation2] sm:$0xff] %vm662_vm3, %v567_v3 }
  0xd1   : > { %1539 = vrot.lane.b32.xlu1 %v3196_v6, %s3079_s10  ;;  %961 = vrot.lane.b32.xlu0 %v3199_v7, %s3076_s13 }
  0xd3   : > { %v573_v23 = vpop.permute.xlu1 %572  ;;  %v571_v29 = vpop.permute.xlu0 %570 }
  0xd4   : > { %666 = vst.msk [vmem:[#allocation2 + $0x18] sm:$0xff] %vm662_vm3, %v573_v23  ;;  %665 = vst.msk [vmem:[#allocation2 + $0x10] sm:$0xff] %vm662_vm3, %v571_v29 }
  0xd5   : > { %963 = vrot.lane.b32.xlu1 %v3196_v6, %s3076_s13  ;;  %1730 = vrot.lane.b32.xlu0 %v3441_v43, %s3080_s16 }
  0xd7   : > { %v577_v22 = vpop.permute.xlu1 %576  ;;  %v575_v0 = vpop.permute.xlu0 %574 }
  0xd8   : > { %668 = vst.msk [vmem:[#allocation2 + $0x28] sm:$0xff] %vm662_vm3, %v577_v22  ;;  %667 = vst.msk [vmem:[#allocation2 + $0x20] sm:$0xff] %vm662_vm3, %v575_v0 }
  0xd9   : > { %1732 = vrot.lane.b32.xlu1 %v3438_v42, %s3080_s16  ;;  %1154 = vrot.lane.b32.xlu0 %v3441_v43, %s3077_s14 }
  0xdb   : > { %v581_v7 = vpop.permute.xlu1 %580  ;;  %v579_v58 = vpop.permute.xlu0 %578 }
  0xdc   : > { %670 = vst.msk [vmem:[#allocation2 + $0x38] sm:$0xff] %vm662_vm3, %v581_v7  ;;  %669 = vst.msk [vmem:[#allocation2 + $0x30] sm:$0xff] %vm662_vm3, %v579_v58 }
  0xdd   : > { %1348 = vrot.lane.b32.xlu1 %v3277_v25, %s3078_s25  ;;  %1156 = vrot.lane.b32.xlu0 %v3438_v42, %s3077_s14 }
  0xdf   : > { %v585_v6 = vpop.permute.xlu1 %584  ;;  %v583_v59 = vpop.permute.xlu0 %582 }
  0xe0   : > { %672 = vst.msk [vmem:[#allocation2 + $0x48] sm:$0xff] %vm662_vm3, %v585_v6  ;;  %671 = vst.msk [vmem:[#allocation2 + $0x40] sm:$0xff] %vm662_vm3, %v583_v59  ;;  %v2725_v6 = vld [vmem:[%s3169_s9 + $0xc9] sm:$0xff] }
  0xe1   : > { %1541 = vrot.lane.b32.xlu1 %v3209_v9, %s3079_s10  ;;  %1350 = vrot.lane.b32.xlu0 %v3274_v24, %s3078_s25 }
  0xe3   : > { %v589_v43 = vpop.permute.xlu1 %588  ;;  %v587_v2 = vpop.permute.xlu0 %586 }
  0xe4   : > { %674 = vst.msk [vmem:[#allocation2 + $0x58] sm:$0xff] %vm662_vm3, %v589_v43  ;;  %673 = vst.msk [vmem:[#allocation2 + $0x50] sm:$0xff] %vm662_vm3, %v587_v2 }
  0xe5   : > { %1543 = vrot.lane.b32.xlu1 %v3206_v8, %s3079_s10  ;;  %965 = vrot.lane.b32.xlu0 %v3209_v9, %s3076_s13 }
  0xe7   : > { %v593_v25 = vpop.permute.xlu1 %592  ;;  %v591_v42 = vpop.permute.xlu0 %590 }
  0xe8   : > { %676 = vst.msk [vmem:[#allocation2 + $0x68] sm:$0xff] %vm662_vm3, %v593_v25  ;;  %675 = vst.msk [vmem:[#allocation2 + $0x60] sm:$0xff] %vm662_vm3, %v591_v42 }
  0xe9   : > { %967 = vrot.lane.b32.xlu1 %v3206_v8, %s3076_s13  ;;  %1734 = vrot.lane.b32.xlu0 %v3451_v47, %s3080_s16 }
  0xeb   : > { %v597_v24 = vpop.permute.xlu1 %596  ;;  %v595_v17 = vpop.permute.xlu0 %594 }
  0xec   : > { %678 = vst.msk [vmem:[#allocation2 + $0x78] sm:$0xff] %vm662_vm3, %v597_v24  ;;  %677 = vst.msk [vmem:[#allocation2 + $0x70] sm:$0xff] %vm662_vm3, %v595_v17 }
  0xed   : > { %1736 = vrot.lane.b32.xlu1 %v3448_v46, %s3080_s16  ;;  %1158 = vrot.lane.b32.xlu0 %v3451_v47, %s3077_s14 }
  0xef   : > { %v601_v9 = vpop.permute.xlu1 %600  ;;  %v599_v60 = vpop.permute.xlu0 %598 }
  0xf0   : > { %680 = vst.msk [vmem:[#allocation2 + $0x88] sm:$0xff] %vm662_vm3, %v601_v9  ;;  %679 = vst.msk [vmem:[#allocation2 + $0x80] sm:$0xff] %vm662_vm3, %v599_v60 }
  0xf1   : > { %1160 = vrot.lane.b32.xlu0 %v3448_v46, %s3077_s14  ;;  %1352 = vrot.lane.b32.xlu1 %v3289_v27, %s3078_s25 }
  0xf3   : > { %v605_v8 = vpop.permute.xlu1 %604  ;;  %v603_v61 = vpop.permute.xlu0 %602 }
  0xf4   : > { %682 = vst.msk [vmem:[#allocation2 + $0x98] sm:$0xff] %vm662_vm3, %v605_v8  ;;  %681 = vst.msk [vmem:[#allocation2 + $0x90] sm:$0xff] %vm662_vm3, %v603_v61 }
  0xf5   : > { %1354 = vrot.lane.b32.xlu0 %v3286_v26, %s3078_s25  ;;  %1545 = vrot.lane.b32.xlu1 %v3219_v11, %s3079_s10 }
  0xf7   : > { %v609_v47 = vpop.permute.xlu1 %608  ;;  %v607_v20 = vpop.permute.xlu0 %606 }
  0xf8   : > { %684 = vst.msk [vmem:[#allocation2 + $0xa8] sm:$0xff] %vm662_vm3, %v609_v47  ;;  %683 = vst.msk [vmem:[#allocation2 + $0xa0] sm:$0xff] %vm662_vm3, %v607_v20  ;;  %v2758_v20 = vld [vmem:[%s3169_s9 + $0xda] sm:$0xff] }
  0xf9   : > { %778 = vrot.lane.b32.xlu0 %v3286_v26, %s3075_s12  ;;  %969 = vrot.lane.b32.xlu1 %v3219_v11, %s3076_s13 }
  0xfb   : > { %v613_v27 = vpop.permute.xlu1 %612  ;;  %v611_v46 = vpop.permute.xlu0 %610 }
  0xfc   : > { %686 = vst.msk [vmem:[#allocation2 + $0xb8] sm:$0xff] %vm662_vm3, %v613_v27  ;;  %685 = vst.msk [vmem:[#allocation2 + $0xb0] sm:$0xff] %vm662_vm3, %v611_v46 }
  0xfd   : > { %1547 = vrot.lane.b32.xlu0 %v3216_v10, %s3079_s10  ;;  %1738 = vrot.lane.b32.xlu1 %v3461_v49, %s3080_s16 }
  0xff   : > { %v617_v13 = vpop.permute.xlu1 %616  ;;  %v615_v12 = vpop.permute.xlu0 %614 }
 0x100   : > { %688 = vst.msk [vmem:[#allocation2 + $0xc8] sm:$0xff] %vm662_vm3, %v617_v13  ;;  %687 = vst.msk [vmem:[#allocation2 + $0xc0] sm:$0xff] %vm662_vm3, %v615_v12 }
 0x101   : > { %971 = vrot.lane.b32.xlu0 %v3216_v10, %s3076_s13  ;;  %1162 = vrot.lane.b32.xlu1 %v3461_v49, %s3077_s14 }
 0x103   : > { %v621_v11 = vpop.permute.xlu1 %620  ;;  %v619_v26 = vpop.permute.xlu0 %618 }
 0x104   : > { %690 = vst.msk [vmem:[#allocation2 + $0xd8] sm:$0xff] %vm662_vm3, %v621_v11  ;;  %689 = vst.msk [vmem:[#allocation2 + $0xd0] sm:$0xff] %vm662_vm3, %v619_v26 }
 0x105   : > { %1740 = vrot.lane.b32.xlu0 %v3458_v48, %s3080_s16  ;;  %1164 = vrot.lane.b32.xlu1 %v3458_v48, %s3077_s14 }
 0x107   : > { %v625_v19 = vpop.permute.xlu1 %624  ;;  %v623_v16 = vpop.permute.xlu0 %622 }
 0x108   : > { %692 = vst.msk [vmem:[#allocation2 + $0xe8] sm:$0xff] %vm662_vm3, %v625_v19  ;;  %691 = vst.msk [vmem:[#allocation2 + $0xe0] sm:$0xff] %vm662_vm3, %v623_v16 }
 0x109   : > { %1356 = vrot.lane.b32.xlu0 %v3303_v31, %s3078_s25  ;;  %780 = vrot.lane.b32.xlu1 %v3303_v31, %s3075_s12 }
 0x10b   : > { %v629_v10 = vpop.permute.xlu1 %628  ;;  %v627_v49 = vpop.permute.xlu0 %626 }
 0x10c   : > { %694 = vst.msk [vmem:[#allocation2 + $0xf8] sm:$0xff] %vm662_vm3, %v629_v10  ;;  %693 = vst.msk [vmem:[#allocation2 + $0xf0] sm:$0xff] %vm662_vm3, %v627_v49 }
 0x10d   : > { %1358 = vrot.lane.b32.xlu0 %v3292_v28, %s3078_s25  ;;  %1549 = vrot.lane.b32.xlu1 %v3233_v15, %s3079_s10 }
 0x10f   : > { %v763_v48 = vpop.permute.xlu1 %762  ;;  %v761_v62 = vpop.permute.xlu0 %760 }
 0x110   : > { %858 = vst.msk [vmem:[#allocation2 + $0x8] sm:$0xff] %vm856_vm4, %v763_v48  ;;  %857 = vst.msk [vmem:[#allocation2] sm:$0xff] %vm856_vm4, %v761_v62  ;;  %v2728_v48 = vld [vmem:[%s3169_s9 + $0xf1] sm:$0xff] }
 0x111   : > { %782 = vrot.lane.b32.xlu0 %v3292_v28, %s3075_s12  ;;  %973 = vrot.lane.b32.xlu1 %v3233_v15, %s3076_s13 }
 0x113   : > { %v767_v31 = vpop.permute.xlu1 %766  ;;  %v765_v5 = vpop.permute.xlu0 %764 }
 0x114   : > { %860 = vst.msk [vmem:[#allocation2 + $0x18] sm:$0xff] %vm856_vm4, %v767_v31  ;;  %859 = vst.msk [vmem:[#allocation2 + $0x10] sm:$0xff] %vm856_vm4, %v765_v5 }
 0x115   : > { %1551 = vrot.lane.b32.xlu0 %v3230_v14, %s3079_s10  ;;  %1742 = vrot.lane.b32.xlu1 %v3471_v51, %s3080_s16 }
 0x117   : > { %v771_v63 = vpop.permute.xlu1 %770  ;;  %v769_v56 = vpop.permute.xlu0 %768 }
 0x118   : > { %862 = vst.msk [vmem:[#allocation2 + $0x28] sm:$0xff] %vm856_vm4, %v771_v63  ;;  %861 = vst.msk [vmem:[#allocation2 + $0x20] sm:$0xff] %vm856_vm4, %v769_v56  ;;  %v2760_v56 = vld [vmem:[%s3169_s9 + $0xf2] sm:$0xff] }
 0x119   : > { %975 = vrot.lane.b32.xlu0 %v3230_v14, %s3076_s13  ;;  %1166 = vrot.lane.b32.xlu1 %v3471_v51, %s3077_s14 }
 0x11b   : > { %v775_v15 = vpop.permute.xlu1 %774  ;;  %v773_v28 = vpop.permute.xlu0 %772 }
 0x11c   : > { %864 = vst.msk [vmem:[#allocation2 + $0x38] sm:$0xff] %vm856_vm4, %v775_v15  ;;  %863 = vst.msk [vmem:[#allocation2 + $0x30] sm:$0xff] %vm856_vm4, %v773_v28 }
 0x11d   : > { %1744 = vrot.lane.b32.xlu0 %v3468_v50, %s3080_s16  ;;  %1168 = vrot.lane.b32.xlu1 %v3468_v50, %s3077_s14 }
 0x11f   : > { %v954_v57 = vpop.permute.xlu1 %953  ;;  %v777_v4 = vpop.permute.xlu0 %776 }
 0x120   : > { %1050 = vst.msk [vmem:[#allocation2] sm:$0xff] %vm1049_vm5, %v954_v57 }
 0x121   : > { %865 = vst.msk [vmem:[#allocation2 + $0x40] sm:$0xff] %vm856_vm4, %v777_v4  ;;  %1360 = vrot.lane.b32.xlu0 %v3309_v33, %s3078_s25  ;;  %784 = vrot.lane.b32.xlu1 %v3309_v33, %s3075_s12 }
 0x123   : > { %v1147_v14 = vpop.permute.xlu1 %1146  ;;  %v956_v51 = vpop.permute.xlu0 %955 }
 0x124   : > { %1243 = vst.msk [vmem:[#allocation2] sm:$0xff] %vm1242_vm6, %v1147_v14 }
 0x125   : > { %1051 = vst.msk [vmem:[#allocation2 + $0x8] sm:$0xff] %vm1049_vm5, %v956_v51  ;;  %1362 = vrot.lane.b32.xlu0 %v3306_v32, %s3078_s25  ;;  %1553 = vrot.lane.b32.xlu1 %v3259_v21, %s3079_s10 }
 0x127   : > { %v1341_v50 = vpop.permute.xlu1 %1340  ;;  %v1149_v1 = vpop.permute.xlu0 %1148 }
 0x128   : > { %1437 = vst.msk [vmem:[#allocation2] sm:$0xff] %vm1436_vm7, %v1341_v50 }
 0x129   : > { %1244 = vst.msk [vmem:[#allocation2 + $0x8] sm:$0xff] %vm1242_vm6, %v1149_v1  ;;  %786 = vrot.lane.b32.xlu0 %v3306_v32, %s3075_s12  ;;  %977 = vrot.lane.b32.xlu1 %v3259_v21, %s3076_s13 }
 0x12b   : > { %v1534_v33 = vpop.permute.xlu1 %1533  ;;  %v1343_v30 = vpop.permute.xlu0 %1342 }
 0x12c   : > { %1630 = vst.msk [vmem:[#allocation2] sm:$0xff] %vm1629_vm8, %v1534_v33 }
 0x12d   : > { %1438 = vst.msk [vmem:[#allocation2 + $0x8] sm:$0xff] %vm1436_vm7, %v1343_v30  ;;  %1555 = vrot.lane.b32.xlu0 %v3245_v18, %s3079_s10  ;;  %1746 = vrot.lane.b32.xlu1 %v3481_v53, %s3080_s16 }
 0x12f   : > { %v1536_v3 = vpop.permute.xlu1 %1535  ;;  %v958_v23 = vpop.permute.xlu0 %957 }
 0x130   : > { %1631 = vst.msk [vmem:[#allocation2 + $0x8] sm:$0xff] %vm1629_vm8, %v1536_v3  ;;  %v2730_v3 = vld [vmem:[%s3169_s9 + $0x109] sm:$0xff] }
 0x131   : > { %1052 = vst.msk [vmem:[#allocation2 + $0x10] sm:$0xff] %vm1049_vm5, %v958_v23  ;;  %979 = vrot.lane.b32.xlu0 %v3245_v18, %s3076_s13  ;;  %1170 = vrot.lane.b32.xlu1 %v3481_v53, %s3077_s14  ;;  %v2724_v18 = vld [vmem:[%s3169_s9 + $0xc1] sm:$0xff] }
 0x133   : > { %v960_v21 = vpop.permute.xlu1 %959  ;;  %v1727_v32 = vpop.permute.xlu0 %1726 }
 0x134   : > { %1053 = vst.msk [vmem:[#allocation2 + $0x18] sm:$0xff] %vm1049_vm5, %v960_v21 }
 0x135   : > { %1823 = vst.msk [vmem:[#allocation2] sm:$0xff] %vm1822_vm9, %v1727_v32  ;;  %1748 = vrot.lane.b32.xlu0 %v3478_v52, %s3080_s16  ;;  %1172 = vrot.lane.b32.xlu1 %v3478_v52, %s3077_s14 }
 0x137   : > { %v1729_v29 = vpop.permute.xlu1 %1728  ;;  %v1151_v22 = vpop.permute.xlu0 %1150 }
 0x138   : > { %1824 = vst.msk [vmem:[#allocation2 + $0x8] sm:$0xff] %vm1822_vm9, %v1729_v29 }
 0x139   : > { %1245 = vst.msk [vmem:[#allocation2 + $0x10] sm:$0xff] %vm1242_vm6, %v1151_v22  ;;  %1364 = vrot.lane.b32.xlu0 %v3325_v35, %s3078_s25  ;;  %788 = vrot.lane.b32.xlu1 %v3325_v35, %s3075_s12  ;;  %v2762_v22 = vld [vmem:[%s3169_s9 + $0x10a] sm:$0xff] }
 0x13b   : > { %v1345_v53 = vpop.permute.xlu1 %1344  ;;  %v1153_v0 = vpop.permute.xlu0 %1152 }
 0x13c   : > { %v1855_v7 = vld [vmem:[#allocation2] sm:$0xff]  ;;  %1439 = vst.msk [vmem:[#allocation2 + $0x10] sm:$0xff] %vm1436_vm7, %v1345_v53 }
 0x13d   : > { %1246 = vst.msk [vmem:[#allocation2 + $0x18] sm:$0xff] %vm1242_vm6, %v1153_v0  ;;  %2862 = vmatprep.mubr.msk.f32.mxu0 %vm1899_vm10, %v1855_v7  ;;  %1366 = vrot.lane.b32.xlu0 %v3322_v34, %s3078_s25 }
 0x13e   : > { %1557 = vrot.lane.b32.xlu1 %v2724_v18, %s3079_s10 }
 0x13f   : > { %v1538_v52 = vpop.permute.xlu1 %1537  ;;  %v1347_v58 = vpop.permute.xlu0 %1346  ;;  %v1856_v35 = vld [vmem:[#allocation2 + $0x8] sm:$0xff] }
 0x140   : > { %1632 = vst.msk [vmem:[#allocation2 + $0x10] sm:$0xff] %vm1629_vm8, %v1538_v52  ;;  %2863 = vmatmul.mubr.msk.f32.vlgmr.msra.gmra.mrb[0].mxu0 %vm1899_vm10, %v1856_v35 }
 0x141   : > { %1440 = vst.msk [vmem:[#allocation2 + $0x18] sm:$0xff] %vm1436_vm7, %v1347_v58  ;;  %790 = vrot.lane.b32.xlu0 %v3322_v34, %s3075_s12 }
 0x142   : > { %981 = vrot.lane.b32.xlu1 %v2724_v18, %s3076_s13 }
 0x143   : > { %v1540_v59 = vpop.permute.xlu1 %1539  ;;  %v962_v43 = vpop.permute.xlu0 %961 }
 0x144   : > { %1633 = vst.msk [vmem:[#allocation2 + $0x18] sm:$0xff] %vm1629_vm8, %v1540_v59 }
 0x145   : > { %1054 = vst.msk [vmem:[#allocation2 + $0x20] sm:$0xff] %vm1049_vm5, %v962_v43  ;;  %1559 = vrot.lane.b32.xlu0 %v2725_v6, %s3079_s10 }
 0x146   : > { %1750 = vrot.lane.b32.xlu1 %v3491_v55, %s3080_s16 }
 0x147   : > { %v964_v2 = vpop.permute.xlu1 %963  ;;  %v1731_v25 = vpop.permute.xlu0 %1730 }
 0x148   : > { %1055 = vst.msk [vmem:[#allocation2 + $0x28] sm:$0xff] %vm1049_vm5, %v964_v2  ;;  %v2732_v2 = vld [vmem:[%s3169_s9 + $0x121] sm:$0xff] }
 0x149   : > { %1825 = vst.msk [vmem:[#allocation2 + $0x10] sm:$0xff] %vm1822_vm9, %v1731_v25  ;;  %983 = vrot.lane.b32.xlu0 %v2725_v6, %s3076_s13 }
 0x14a   : > { %1174 = vrot.lane.b32.xlu1 %v3491_v55, %s3077_s14  ;;  %v2726_v55 = vld [vmem:[%s3169_s9 + $0xd9] sm:$0xff] }
 0x14b   : > { %v1733_v34 = vpop.permute.xlu1 %1732  ;;  %v1155_v42 = vpop.permute.xlu0 %1154 }
 0x14c   : > { %1826 = vst.msk [vmem:[#allocation2 + $0x18] sm:$0xff] %vm1822_vm9, %v1733_v34 }
 0x14d   : > { %1247 = vst.msk [vmem:[#allocation2 + $0x20] sm:$0xff] %vm1242_vm6, %v1155_v42  ;;  %1752 = vrot.lane.b32.xlu0 %v3488_v54, %s3080_s16 }
 0x14e   : > { %1176 = vrot.lane.b32.xlu1 %v3488_v54, %s3077_s14 }
 0x14f   : > { %v1349_v24 = vpop.permute.xlu1 %1348  ;;  %v1157_v17 = vpop.permute.xlu0 %1156 }
 0x150   : > { %v1857_v9 = vld [vmem:[#allocation2 + $0x10] sm:$0xff]  ;;  %1441 = vst.msk [vmem:[#allocation2 + $0x20] sm:$0xff] %vm1436_vm7, %v1349_v24 }
 0x151   : > { %1248 = vst.msk [vmem:[#allocation2 + $0x28] sm:$0xff] %vm1242_vm6, %v1157_v17  ;;  %2865 = vmatprep.mubr.msk.f32.mxu0 %vm1899_vm10, %v1857_v9  ;;  %1368 = vrot.lane.b32.xlu0 %v3335_v37, %s3078_s25  ;;  %v2764_v17 = vld [vmem:[%s3169_s9 + $0x122] sm:$0xff] }
 0x152   : > { %792 = vrot.lane.b32.xlu1 %v3335_v37, %s3075_s12  ;;  %v2727_v37 = vld [vmem:[%s3169_s9 + $0xe1] sm:$0xff] }
 0x153   : > { %v1542_v60 = vpop.permute.xlu1 %1541  ;;  %v1351_v54 = vpop.permute.xlu0 %1350  ;;  %v1858_v8 = vld [vmem:[#allocation2 + $0x18] sm:$0xff] }
 0x154   : > { %1634 = vst.msk [vmem:[#allocation2 + $0x20] sm:$0xff] %vm1629_vm8, %v1542_v60  ;;  %2866 = vmatmul.mubr.msk.f32.gmra.mrb[2].mxu0 %vm1899_vm10, %v1858_v8 }
 0x155   : > { %1442 = vst.msk [vmem:[#allocation2 + $0x28] sm:$0xff] %vm1436_vm7, %v1351_v54  ;;  %1370 = vrot.lane.b32.xlu0 %v3332_v36, %s3078_s25 }
 0x156   : > { %1561 = vrot.lane.b32.xlu1 %v2726_v55, %s3079_s10 }
 0x157   : > { %v1544_v61 = vpop.permute.xlu1 %1543  ;;  %v966_v47 = vpop.permute.xlu0 %965 }
 0x158   : > { %1635 = vst.msk [vmem:[#allocation2 + $0x28] sm:$0xff] %vm1629_vm8, %v1544_v61 }
 0x159   : > { %1056 = vst.msk [vmem:[#allocation2 + $0x30] sm:$0xff] %vm1049_vm5, %v966_v47  ;;  %794 = vrot.lane.b32.xlu0 %v3332_v36, %s3075_s12  ;;  %v2759_v36 = vld [vmem:[%s3169_s9 + $0xe2] sm:$0xff] }
 0x15a   : > { %985 = vrot.lane.b32.xlu1 %v2726_v55, %s3076_s13 }
 0x15b   : > { %v968_v27 = vpop.permute.xlu1 %967  ;;  %v1735_v46 = vpop.permute.xlu0 %1734 }
 0x15c   : > { %1057 = vst.msk [vmem:[#allocation2 + $0x38] sm:$0xff] %vm1049_vm5, %v968_v27 }
 0x15d   : > { %1827 = vst.msk [vmem:[#allocation2 + $0x20] sm:$0xff] %vm1822_vm9, %v1735_v46  ;;  %1563 = vrot.lane.b32.xlu0 %v2727_v37, %s3079_s10 }
 0x15e   : > { %1754 = vrot.lane.b32.xlu1 %v2758_v20, %s3080_s16 }
 0x15f   : > { %v1737_v13 = vpop.permute.xlu1 %1736  ;;  %v1159_v12 = vpop.permute.xlu0 %1158 }
 0x160   : > { %1828 = vst.msk [vmem:[#allocation2 + $0x28] sm:$0xff] %vm1822_vm9, %v1737_v13  ;;  %v2703_v13 = vld [vmem:[%s3169_s9 + $0x140] sm:$0xff] }
 0x161   : > { %1249 = vst.msk [vmem:[#allocation2 + $0x30] sm:$0xff] %vm1242_vm6, %v1159_v12  ;;  %987 = vrot.lane.b32.xlu0 %v2727_v37, %s3076_s13  ;;  %v2702_v37 = vld [vmem:[%s3169_s9 + $0x138] sm:$0xff] }
 0x162   : > { %1178 = vrot.lane.b32.xlu1 %v2758_v20, %s3077_s14  ;;  %v2734_v12 = vld [vmem:[%s3169_s9 + $0x139] sm:$0xff] }
 0x163   : > { %v1161_v11 = vpop.permute.xlu0 %1160  ;;  %v1353_v26 = vpop.permute.xlu1 %1352 }
 0x164   : > { %v1859_v19 = vld [vmem:[#allocation2 + $0x20] sm:$0xff]  ;;  %1250 = vst.msk [vmem:[#allocation2 + $0x38] sm:$0xff] %vm1242_vm6, %v1161_v11 }
 0x165   : > { %1443 = vst.msk [vmem:[#allocation2 + $0x30] sm:$0xff] %vm1436_vm7, %v1353_v26  ;;  %2868 = vmatprep.mubr.msk.f32.mxu0 %vm1899_vm10, %v1859_v19  ;;  %1756 = vrot.lane.b32.xlu0 %v2759_v36, %s3080_s16 }
 0x166   : > { %1180 = vrot.lane.b32.xlu1 %v2759_v36, %s3077_s14 }
 0x167   : > { %v1355_v16 = vpop.permute.xlu0 %1354  ;;  %v1546_v10 = vpop.permute.xlu1 %1545  ;;  %v1860_v49 = vld [vmem:[#allocation2 + $0x28] sm:$0xff] }
 0x168   : > { %1444 = vst.msk [vmem:[#allocation2 + $0x38] sm:$0xff] %vm1436_vm7, %v1355_v16  ;;  %2869 = vmatmul.mubr.msk.f32.gmra.mrb[4].mxu0 %vm1899_vm10, %v1860_v49  ;;  %v2735_v16 = vld [vmem:[%s3169_s9 + $0x141] sm:$0xff] }
 0x169   : > { %1636 = vst.msk [vmem:[#allocation2 + $0x30] sm:$0xff] %vm1629_vm8, %v1546_v10  ;;  %1372 = vrot.lane.b32.xlu0 %v3347_v39, %s3078_s25  ;;  %v2766_v10 = vld [vmem:[%s3169_s9 + $0x13a] sm:$0xff] }
 0x16a   : > { %796 = vrot.lane.b32.xlu1 %v3347_v39, %s3075_s12  ;;  %v2729_v39 = vld [vmem:[%s3169_s9 + $0xf9] sm:$0xff] }
 0x16b   : > { %v779_v62 = vpop.permute.xlu0 %778  ;;  %v970_v31 = vpop.permute.xlu1 %969 }
 0x16c   : > { %866 = vst.msk [vmem:[#allocation2 + $0x48] sm:$0xff] %vm856_vm4, %v779_v62 }
 0x16d   : > { %1058 = vst.msk [vmem:[#allocation2 + $0x40] sm:$0xff] %vm1049_vm5, %v970_v31  ;;  %1374 = vrot.lane.b32.xlu0 %v3338_v38, %s3078_s25 }
 0x16e   : > { %1565 = vrot.lane.b32.xlu1 %v2728_v48, %s3079_s10 }
 0x16f   : > { %v1548_v5 = vpop.permute.xlu0 %1547  ;;  %v1739_v63 = vpop.permute.xlu1 %1738 }
 0x170   : > { %1637 = vst.msk [vmem:[#allocation2 + $0x38] sm:$0xff] %vm1629_vm8, %v1548_v5 }
 0x171   : > { %1829 = vst.msk [vmem:[#allocation2 + $0x30] sm:$0xff] %vm1822_vm9, %v1739_v63  ;;  %798 = vrot.lane.b32.xlu0 %v3338_v38, %s3075_s12  ;;  %v2761_v38 = vld [vmem:[%s3169_s9 + $0xfa] sm:$0xff]  ;;  %v2767_v63 = vld [vmem:[%s3169_s9 + $0x142] sm:$0xff] }
 0x172   : > { %989 = vrot.lane.b32.xlu1 %v2728_v48, %s3076_s13 }
 0x173   : > { %v972_v15 = vpop.permute.xlu0 %971  ;;  %v1163_v28 = vpop.permute.xlu1 %1162 }
 0x174   : > { %1059 = vst.msk [vmem:[#allocation2 + $0x48] sm:$0xff] %vm1049_vm5, %v972_v15  ;;  %v2704_v15 = vld [vmem:[%s3169_s9 + $0x150] sm:$0xff] }
 0x175   : > { %1251 = vst.msk [vmem:[#allocation2 + $0x40] sm:$0xff] %vm1242_vm6, %v1163_v28  ;;  %1567 = vrot.lane.b32.xlu0 %v2729_v39, %s3079_s10 }
 0x176   : > { %1758 = vrot.lane.b32.xlu1 %v2760_v56, %s3080_s16 }
 0x177   : > { %v1741_v57 = vpop.permute.xlu0 %1740  ;;  %v1165_v4 = vpop.permute.xlu1 %1164 }
 0x178   : > { %v1861_v14 = vld [vmem:[#allocation2 + $0x30] sm:$0xff]  ;;  %1830 = vst.msk [vmem:[#allocation2 + $0x38] sm:$0xff] %vm1822_vm9, %v1741_v57 }
 0x179   : > { %1252 = vst.msk [vmem:[#allocation2 + $0x48] sm:$0xff] %vm1242_vm6, %v1165_v4  ;;  %2871 = vmatprep.mubr.msk.f32.mxu0 %vm1899_vm10, %v1861_v14  ;;  %991 = vrot.lane.b32.xlu0 %v2729_v39, %s3076_s13  ;;  %v2705_v14 = vld [vmem:[%s3169_s9 + $0x158] sm:$0xff] }
 0x17a   : > { %1182 = vrot.lane.b32.xlu1 %v2760_v56, %s3077_s14 }
 0x17b   : > { %v1357_v51 = vpop.permute.xlu0 %1356  ;;  %v781_v50 = vpop.permute.xlu1 %780 }
 0x17c   : > { %1445 = vst.msk [vmem:[#allocation2 + $0x40] sm:$0xff] %vm1436_vm7, %v1357_v51 }
 0x17d   : > { %867 = vst.msk [vmem:[#allocation2 + $0x50] sm:$0xff] %vm856_vm4, %v781_v50  ;;  %1760 = vrot.lane.b32.xlu0 %v2761_v38, %s3080_s16 }
 0x17e   : > { %1184 = vrot.lane.b32.xlu1 %v2761_v38, %s3077_s14  ;;  %v2736_v38 = vld [vmem:[%s3169_s9 + $0x151] sm:$0xff] }
 0x17f   : > { %v1359_v1 = vpop.permute.xlu0 %1358  ;;  %v1550_v33 = vpop.permute.xlu1 %1549  ;;  %v1862_v30 = vld [vmem:[#allocation2 + $0x38] sm:$0xff] }
 0x180   : > { %1446 = vst.msk [vmem:[#allocation2 + $0x48] sm:$0xff] %vm1436_vm7, %v1359_v1  ;;  %2872 = vmatmul.mubr.msk.f32.gmra.mrb[6].mxu0 %vm1899_vm10, %v1862_v30  ;;  %v2737_v30 = vld [vmem:[%s3169_s9 + $0x159] sm:$0xff] }
 0x181   : > { %1638 = vst.msk [vmem:[#allocation2 + $0x40] sm:$0xff] %vm1629_vm8, %v1550_v33  ;;  %1376 = vrot.lane.b32.xlu0 %v3353_v41, %s3078_s25 }
 0x182   : > { %800 = vrot.lane.b32.xlu1 %v3353_v41, %s3075_s12  ;;  %v2731_v41 = vld [vmem:[%s3169_s9 + $0x111] sm:$0xff] }
 0x183   : > { %v783_v23 = vpop.permute.xlu0 %782  ;;  %v974_v21 = vpop.permute.xlu1 %973 }
 0x184   : > { %868 = vst.msk [vmem:[#allocation2 + $0x58] sm:$0xff] %vm856_vm4, %v783_v23 }
 0x185   : > { %1060 = vst.msk [vmem:[#allocation2 + $0x50] sm:$0xff] %vm1049_vm5, %v974_v21  ;;  %1378 = vrot.lane.b32.xlu0 %v3350_v40, %s3078_s25 }
 0x186   : > { %1569 = vrot.lane.b32.xlu1 %v2730_v3, %s3079_s10 }
 0x187   : > { %v1552_v32 = vpop.permute.xlu0 %1551  ;;  %v1743_v29 = vpop.permute.xlu1 %1742 }
 0x188   : > { %1639 = vst.msk [vmem:[#allocation2 + $0x48] sm:$0xff] %vm1629_vm8, %v1552_v32 }
 0x189   : > { %1831 = vst.msk [vmem:[#allocation2 + $0x40] sm:$0xff] %vm1822_vm9, %v1743_v29  ;;  %802 = vrot.lane.b32.xlu0 %v3350_v40, %s3075_s12  ;;  %v2763_v40 = vld [vmem:[%s3169_s9 + $0x112] sm:$0xff] }
 0x18a   : > { %993 = vrot.lane.b32.xlu1 %v2730_v3, %s3076_s13  ;;  %v2768_v3 = vld [vmem:[%s3169_s9 + $0x152] sm:$0xff] }
 0x18b   : > { %v976_v18 = vpop.permute.xlu0 %975  ;;  %v1167_v53 = vpop.permute.xlu1 %1166 }
 0x18c   : > { %1061 = vst.msk [vmem:[#allocation2 + $0x58] sm:$0xff] %vm1049_vm5, %v976_v18 }
 0x18d   : > { %1253 = vst.msk [vmem:[#allocation2 + $0x50] sm:$0xff] %vm1242_vm6, %v1167_v53  ;;  %1571 = vrot.lane.b32.xlu0 %v2731_v41, %s3079_s10 }
 0x18e   : > { %1762 = vrot.lane.b32.xlu1 %v2762_v22, %s3080_s16 }
 0x18f   : > { %v1745_v0 = vpop.permute.xlu0 %1744  ;;  %v1169_v7 = vpop.permute.xlu1 %1168 }
 0x190   : > { %v1863_v52 = vld [vmem:[#allocation2 + $0x40] sm:$0xff]  ;;  %1832 = vst.msk [vmem:[#allocation2 + $0x48] sm:$0xff] %vm1822_vm9, %v1745_v0  ;;  %v2706_v0 = vld [vmem:[%s3169_s9 + $0x168] sm:$0xff] }
 0x191   : > { %1254 = vst.msk [vmem:[#allocation2 + $0x58] sm:$0xff] %vm1242_vm6, %v1169_v7  ;;  %2874 = vmatprep.mubr.msk.f32.mxu0 %vm1899_vm10, %v1863_v52  ;;  %995 = vrot.lane.b32.xlu0 %v2731_v41, %s3076_s13 }
 0x192   : > { %1186 = vrot.lane.b32.xlu1 %v2762_v22, %s3077_s14  ;;  %v2769_v22 = vld [vmem:[%s3169_s9 + $0x15a] sm:$0xff] }
 0x193   : > { %v1361_v58 = vpop.permute.xlu0 %1360  ;;  %v785_v35 = vpop.permute.xlu1 %784 }
 0x194   : > { %1447 = vst.msk [vmem:[#allocation2 + $0x50] sm:$0xff] %vm1436_vm7, %v1361_v58  ;;  %v2707_v58 = vld [vmem:[%s3169_s9 + $0x170] sm:$0xff] }
 0x195   : > { %869 = vst.msk [vmem:[#allocation2 + $0x60] sm:$0xff] %vm856_vm4, %v785_v35  ;;  %1764 = vrot.lane.b32.xlu0 %v2763_v40, %s3080_s16  ;;  %v2738_v35 = vld [vmem:[%s3169_s9 + $0x169] sm:$0xff] }
 0x196   : > { %1188 = vrot.lane.b32.xlu1 %v2763_v40, %s3077_s14 }
 0x197   : > { %v1363_v6 = vpop.permute.xlu0 %1362  ;;  %v1554_v59 = vpop.permute.xlu1 %1553  ;;  %v1864_v43 = vld [vmem:[#allocation2 + $0x48] sm:$0xff] }
 0x198   : > { %1448 = vst.msk [vmem:[#allocation2 + $0x58] sm:$0xff] %vm1436_vm7, %v1363_v6  ;;  %2875 = vmatmul.mubr.msk.f32.gmra.mrb[8].mxu0 %vm1899_vm10, %v1864_v43 }
 0x199   : > { %1640 = vst.msk [vmem:[#allocation2 + $0x50] sm:$0xff] %vm1629_vm8, %v1554_v59  ;;  %1380 = vrot.lane.b32.xlu0 %v3366_v44, %s3078_s25 }
 0x19a   : > { %804 = vrot.lane.b32.xlu1 %v3366_v44, %s3075_s12  ;;  %v2733_v44 = vld [vmem:[%s3169_s9 + $0x129] sm:$0xff] }
 0x19b   : > { %v787_v25 = vpop.permute.xlu0 %786  ;;  %v978_v34 = vpop.permute.xlu1 %977 }
 0x19c   : > { %870 = vst.msk [vmem:[#allocation2 + $0x68] sm:$0xff] %vm856_vm4, %v787_v25  ;;  %v2739_v25 = vld [vmem:[%s3169_s9 + $0x171] sm:$0xff] }
 0x19d   : > { %1062 = vst.msk [vmem:[#allocation2 + $0x60] sm:$0xff] %vm1049_vm5, %v978_v34  ;;  %1382 = vrot.lane.b32.xlu0 %v3369_v45, %s3078_s25  ;;  %v2770_v34 = vld [vmem:[%s3169_s9 + $0x16a] sm:$0xff] }
 0x19e   : > { %1573 = vrot.lane.b32.xlu1 %v2732_v2, %s3079_s10 }
 0x19f   : > { %v1556_v42 = vpop.permute.xlu0 %1555  ;;  %v1747_v24 = vpop.permute.xlu1 %1746 }
 0x1a0   : > { %1641 = vst.msk [vmem:[#allocation2 + $0x58] sm:$0xff] %vm1629_vm8, %v1556_v42 }
 0x1a1   : > { %1833 = vst.msk [vmem:[#allocation2 + $0x50] sm:$0xff] %vm1822_vm9, %v1747_v24  ;;  %806 = vrot.lane.b32.xlu0 %v3369_v45, %s3075_s12  ;;  %v2765_v45 = vld [vmem:[%s3169_s9 + $0x12a] sm:$0xff] }
 0x1a2   : > { %997 = vrot.lane.b32.xlu1 %v2732_v2, %s3076_s13 }
 0x1a3   : > { %v980_v9 = vpop.permute.xlu0 %979  ;;  %v1171_v55 = vpop.permute.xlu1 %1170 }
 0x1a4   : > { %1063 = vst.msk [vmem:[#allocation2 + $0x68] sm:$0xff] %vm1049_vm5, %v980_v9 }
 0x1a5   : > { %1255 = vst.msk [vmem:[#allocation2 + $0x60] sm:$0xff] %vm1242_vm6, %v1171_v55  ;;  %1575 = vrot.lane.b32.xlu0 %v2733_v44, %s3079_s10  ;;  %v2771_v55 = vld [vmem:[%s3169_s9 + $0x172] sm:$0xff] }
 0x1a6   : > { %1766 = vrot.lane.b32.xlu1 %v2764_v17, %s3080_s16 }
 0x1a7   : > { %v1749_v60 = vpop.permute.xlu0 %1748  ;;  %v1173_v54 = vpop.permute.xlu1 %1172 }
 0x1a8   : > { %v1865_v8 = vld [vmem:[#allocation2 + $0x50] sm:$0xff]  ;;  %1834 = vst.msk [vmem:[#allocation2 + $0x58] sm:$0xff] %vm1822_vm9, %v1749_v60 }
 0x1a9   : > { %1256 = vst.msk [vmem:[#allocation2 + $0x68] sm:$0xff] %vm1242_vm6, %v1173_v54  ;;  %2877 = vmatprep.mubr.msk.f32.mxu0 %vm1899_vm10, %v1865_v8  ;;  %999 = vrot.lane.b32.xlu0 %v2733_v44, %s3076_s13  ;;  %v2708_v8 = vld [vmem:[%s3169_s9 + $0x180] sm:$0xff] }
 0x1aa   : > { %1190 = vrot.lane.b32.xlu1 %v2764_v17, %s3077_s14 }
 0x1ab   : > { %v1365_v61 = vpop.permute.xlu0 %1364  ;;  %v789_v47 = vpop.permute.xlu1 %788 }
 0x1ac   : > { %1449 = vst.msk [vmem:[#allocation2 + $0x60] sm:$0xff] %vm1436_vm7, %v1365_v61 }
 0x1ad   : > { %871 = vst.msk [vmem:[#allocation2 + $0x70] sm:$0xff] %vm856_vm4, %v789_v47  ;;  %1768 = vrot.lane.b32.xlu0 %v2765_v45, %s3080_s16 }
 0x1ae   : > { %1192 = vrot.lane.b32.xlu1 %v2765_v45, %s3077_s14 }
 0x1af   : > { %v1367_v20 = vpop.permute.xlu0 %1366  ;;  %v1866_v46 = vld [vmem:[#allocation2 + $0x58] sm:$0xff] }
 0x1b0   : > { %v1558_v27 = vpop.permute.xlu1 %1557  ;;  %1450 = vst.msk [vmem:[#allocation2 + $0x68] sm:$0xff] %vm1436_vm7, %v1367_v20  ;;  %2878 = vmatmul.mubr.msk.f32.gmra.mrb[10].mxu0 %vm1899_vm10, %v1866_v46  ;;  %v2740_v20 = vld [vmem:[%s3169_s9 + $0x181] sm:$0xff] }
 0x1b1   : > { %1642 = vst.msk [vmem:[#allocation2 + $0x60] sm:$0xff] %vm1629_vm8, %v1558_v27  ;;  %1384 = vrot.lane.b32.xlu0 %v2702_v37, %s3078_s25 }
 0x1b2   : > { %808 = vrot.lane.b32.xlu1 %v2702_v37, %s3075_s12  ;;  %v2709_v37 = vld [vmem:[%s3169_s9 + $0x188] sm:$0xff] }
 0x1b3   : > { %v791_v36 = vpop.permute.xlu0 %790 }
 0x1b4   : > { %v982_v11 = vpop.permute.xlu1 %981  ;;  %872 = vst.msk [vmem:[#allocation2 + $0x78] sm:$0xff] %vm856_vm4, %v791_v36  ;;  %v2741_v36 = vld [vmem:[%s3169_s9 + $0x189] sm:$0xff] }
 0x1b5   : > { %1064 = vst.msk [vmem:[#allocation2 + $0x70] sm:$0xff] %vm1049_vm5, %v982_v11  ;;  %1386 = vrot.lane.b32.xlu0 %v2703_v13, %s3078_s25  ;;  %v2772_v11 = vld [vmem:[%s3169_s9 + $0x182] sm:$0xff] }
 0x1b6   : > { %1577 = vrot.lane.b32.xlu1 %v2734_v12, %s3079_s10 }
 0x1b7   : > { %v1560_v26 = vpop.permute.xlu0 %1559 }
 0x1b8   : > { %v1751_v19 = vpop.permute.xlu1 %1750  ;;  %1643 = vst.msk [vmem:[#allocation2 + $0x68] sm:$0xff] %vm1629_vm8, %v1560_v26 }
 0x1b9   : > { %1835 = vst.msk [vmem:[#allocation2 + $0x60] sm:$0xff] %vm1822_vm9, %v1751_v19  ;;  %810 = vrot.lane.b32.xlu0 %v2703_v13, %s3075_s12 }
 0x1ba   : > { %1001 = vrot.lane.b32.xlu1 %v2734_v12, %s3076_s13 }
 0x1bb   : > { %v984_v49 = vpop.permute.xlu0 %983 }
 0x1bc   : > { %v1175_v48 = vpop.permute.xlu1 %1174  ;;  %1065 = vst.msk [vmem:[#allocation2 + $0x78] sm:$0xff] %vm1049_vm5, %v984_v49 }
 0x1bd   : > { %1257 = vst.msk [vmem:[#allocation2 + $0x70] sm:$0xff] %vm1242_vm6, %v1175_v48  ;;  %1579 = vrot.lane.b32.xlu0 %v2735_v16, %s3079_s10  ;;  %v2773_v48 = vld [vmem:[%s3169_s9 + $0x18a] sm:$0xff] }
 0x1be   : > { %1770 = vrot.lane.b32.xlu1 %v2766_v10, %s3080_s16 }
 0x1bf   : > { %v1753_v62 = vpop.permute.xlu0 %1752 }
 0x1c0   : > { %v1177_v31 = vpop.permute.xlu1 %1176  ;;  %v1867_v5 = vld [vmem:[#allocation2 + $0x60] sm:$0xff]  ;;  %1836 = vst.msk [vmem:[#allocation2 + $0x68] sm:$0xff] %vm1822_vm9, %v1753_v62 }
 0x1c1   : > { %1258 = vst.msk [vmem:[#allocation2 + $0x78] sm:$0xff] %vm1242_vm6, %v1177_v31  ;;  %2880 = vmatprep.mubr.msk.f32.mxu0 %vm1899_vm10, %v1867_v5  ;;  %1003 = vrot.lane.b32.xlu0 %v2735_v16, %s3076_s13  ;;  %v2710_v5 = vld [vmem:[%s3169_s9 + $0x198] sm:$0xff] }
 0x1c2   : > { %1194 = vrot.lane.b32.xlu1 %v2766_v10, %s3077_s14 }
 0x1c3   : > { %v1369_v39 = vpop.permute.xlu0 %1368 }
 0x1c4   : > { %v793_v56 = vpop.permute.xlu1 %792  ;;  %1451 = vst.msk [vmem:[#allocation2 + $0x70] sm:$0xff] %vm1436_vm7, %v1369_v39 }
 0x1c5   : > { %873 = vst.msk [vmem:[#allocation2 + $0x80] sm:$0xff] %vm856_vm4, %v793_v56  ;;  %1772 = vrot.lane.b32.xlu0 %v2767_v63, %s3080_s16 }
 0x1c6   : > { %1196 = vrot.lane.b32.xlu1 %v2767_v63, %s3077_s14  ;;  %v2711_v63 = vld [vmem:[%s3169_s9 + $0x1a0] sm:$0xff] }
 0x1c7   : > { %v1371_v28 = vpop.permute.xlu0 %1370  ;;  %v1868_v4 = vld [vmem:[#allocation2 + $0x68] sm:$0xff] }
 0x1c8   : > { %v1562_v57 = vpop.permute.xlu1 %1561  ;;  %1452 = vst.msk [vmem:[#allocation2 + $0x78] sm:$0xff] %vm1436_vm7, %v1371_v28  ;;  %2881 = vmatmul.mubr.msk.f32.gmra.mrb[12].mxu0 %vm1899_vm10, %v1868_v4  ;;  %v4092_v28 = vld [vmem:[%s4430_s2] ss:$0 sm:$0xff]  ;;  %v2743_v4 = vld [vmem:[%s3169_s9 + $0x1a1] sm:$0xff] }
 0x1c9   : > { %1644 = vst.msk [vmem:[#allocation2 + $0x70] sm:$0xff] %vm1629_vm8, %v1562_v57  ;;  %1388 = vrot.lane.b32.xlu0 %v2704_v15, %s3078_s25  ;;  %v2742_v57 = vld [vmem:[%s3169_s9 + $0x199] sm:$0xff] }
 0x1ca   : > { %812 = vrot.lane.b32.xlu1 %v2704_v15, %s3075_s12 }
 0x1cb   : > { %v795_v51 = vpop.permute.xlu0 %794 }
 0x1cc   : > { %v986_v50 = vpop.permute.xlu1 %985  ;;  %874 = vst.msk [vmem:[#allocation2 + $0x88] sm:$0xff] %vm856_vm4, %v795_v51 }
 0x1cd   : > { %1066 = vst.msk [vmem:[#allocation2 + $0x80] sm:$0xff] %vm1049_vm5, %v986_v50  ;;  %1390 = vrot.lane.b32.xlu0 %v2705_v14, %s3078_s25 }
 0x1ce   : > { %1581 = vrot.lane.b32.xlu1 %v2736_v38, %s3079_s10 }
 0x1cf   : > { %v1564_v1 = vpop.permute.xlu0 %1563 }
 0x1d0   : > { %v1755_v33 = vpop.permute.xlu1 %1754  ;;  %1645 = vst.msk [vmem:[#allocation2 + $0x78] sm:$0xff] %vm1629_vm8, %v1564_v1 }
 0x1d1   : > { %1837 = vst.msk [vmem:[#allocation2 + $0x70] sm:$0xff] %vm1822_vm9, %v1755_v33  ;;  %814 = vrot.lane.b32.xlu0 %v2705_v14, %s3075_s12 }
 0x1d2   : > { %1005 = vrot.lane.b32.xlu1 %v2736_v38, %s3076_s13 }
 0x1d3   : > { %v988_v23 = vpop.permute.xlu0 %987 }
 0x1d4   : > { %v1179_v21 = vpop.permute.xlu1 %1178  ;;  %1067 = vst.msk [vmem:[#allocation2 + $0x88] sm:$0xff] %vm1049_vm5, %v988_v23  ;;  %v2774_v23 = vld [vmem:[%s3169_s9 + $0x19a] sm:$0xff] }
 0x1d5   : > { %1259 = vst.msk [vmem:[#allocation2 + $0x80] sm:$0xff] %vm1242_vm6, %v1179_v21  ;;  %1583 = vrot.lane.b32.xlu0 %v2737_v30, %s3079_s10  ;;  %v2775_v21 = vld [vmem:[%s3169_s9 + $0x1a2] sm:$0xff]  ;;  %s2810_s9 = sshll.u32 %s3134_s22, 4 }
 0x1d6   : > { %1774 = vrot.lane.b32.xlu1 %v2768_v3, %s3080_s16  ;;  %s4352_s15 = scalar_lea.hbm %s4432_s4, %s2810_s9 }
 0x1d7   : > { %v1757_v32 = vpop.permute.xlu0 %1756 }
 0x1d8   : > { %v1181_v29 = vpop.permute.xlu1 %1180  ;;  %v1869_v41 = vld [vmem:[#allocation2 + $0x70] sm:$0xff]  ;;  %1838 = vst.msk [vmem:[#allocation2 + $0x78] sm:$0xff] %vm1822_vm9, %v1757_v32 }
 0x1d9   : > { %1260 = vst.msk [vmem:[#allocation2 + $0x88] sm:$0xff] %vm1242_vm6, %v1181_v29  ;;  %2883 = vmatprep.mubr.msk.f32.mxu0 %vm1899_vm10, %v1869_v41  ;;  %1007 = vrot.lane.b32.xlu0 %v2737_v30, %s3076_s13 }
 0x1da   : > { %1198 = vrot.lane.b32.xlu1 %v2768_v3, %s3077_s14 }
 0x1db   : > { %v1373_v18 = vpop.permute.xlu0 %1372 }
 0x1dc   : > { %v797_v53 = vpop.permute.xlu1 %796  ;;  %1453 = vst.msk [vmem:[#allocation2 + $0x80] sm:$0xff] %vm1436_vm7, %v1373_v18 }
 0x1dd   : > { %875 = vst.msk [vmem:[#allocation2 + $0x90] sm:$0xff] %vm856_vm4, %v797_v53  ;;  %1776 = vrot.lane.b32.xlu0 %v2769_v22, %s3080_s16 }
 0x1de   : > { %1200 = vrot.lane.b32.xlu1 %v2769_v22, %s3077_s14 }
 0x1df   : > { %v1375_v7 = vpop.permute.xlu0 %1374  ;;  %v1870_v40 = vld [vmem:[#allocation2 + $0x78] sm:$0xff] }
 0x1e0   : > { %v1566_v52 = vpop.permute.xlu1 %1565  ;;  %1454 = vst.msk [vmem:[#allocation2 + $0x88] sm:$0xff] %vm1436_vm7, %v1375_v7  ;;  %2884 = vmatmul.mubr.msk.f32.gmra.mrb[14].mxu0 %vm1899_vm10, %v1870_v40 }
 0x1e1   : > { %1646 = vst.msk [vmem:[#allocation2 + $0x80] sm:$0xff] %vm1629_vm8, %v1566_v52  ;;  %1392 = vrot.lane.b32.xlu0 %v2706_v0, %s3078_s25 }
 0x1e2   : > { %816 = vrot.lane.b32.xlu1 %v2706_v0, %s3075_s12 }
 0x1e3   : > { %v799_v6 = vpop.permute.xlu0 %798 }
 0x1e4   : > { %v990_v59 = vpop.permute.xlu1 %989  ;;  %876 = vst.msk [vmem:[#allocation2 + $0x98] sm:$0xff] %vm856_vm4, %v799_v6 }
 0x1e5   : > { %1068 = vst.msk [vmem:[#allocation2 + $0x90] sm:$0xff] %vm1049_vm5, %v990_v59  ;;  %1394 = vrot.lane.b32.xlu0 %v2707_v58, %s3078_s25 }
 0x1e6   : > { %1585 = vrot.lane.b32.xlu1 %v2738_v35, %s3079_s10 }
 0x1e7   : > { %v1568_v43 = vpop.permute.xlu0 %1567 }
 0x1e8   : > { %v1759_v2 = vpop.permute.xlu1 %1758  ;;  %1647 = vst.msk [vmem:[#allocation2 + $0x88] sm:$0xff] %vm1629_vm8, %v1568_v43 }
 0x1e9   : > { %1839 = vst.msk [vmem:[#allocation2 + $0x80] sm:$0xff] %vm1822_vm9, %v1759_v2  ;;  %818 = vrot.lane.b32.xlu0 %v2707_v58, %s3075_s12 }
 0x1ea   : > { %1009 = vrot.lane.b32.xlu1 %v2738_v35, %s3076_s13 }
 0x1eb   : > { %v992_v42 = vpop.permute.xlu0 %991 }
 0x1ec   : > { %v1183_v24 = vpop.permute.xlu1 %1182  ;;  %1069 = vst.msk [vmem:[#allocation2 + $0x98] sm:$0xff] %vm1049_vm5, %v992_v42 }
 0x1ed   : > { %1261 = vst.msk [vmem:[#allocation2 + $0x90] sm:$0xff] %vm1242_vm6, %v1183_v24  ;;  %1587 = vrot.lane.b32.xlu0 %v2739_v25, %s3079_s10 }
 0x1ee   : > { %1778 = vrot.lane.b32.xlu1 %v2770_v34, %s3080_s16 }
 0x1ef   : > { %v1761_v44 = vpop.permute.xlu0 %1760 }
 0x1f0   : > { %v1185_v17 = vpop.permute.xlu1 %1184  ;;  %v1871_v9 = vld [vmem:[#allocation2 + $0x80] sm:$0xff]  ;;  %1840 = vst.msk [vmem:[#allocation2 + $0x88] sm:$0xff] %vm1822_vm9, %v1761_v44 }
 0x1f1   : > { %1262 = vst.msk [vmem:[#allocation2 + $0x98] sm:$0xff] %vm1242_vm6, %v1185_v17  ;;  %2886 = vmatprep.mubr.msk.f32.mxu1 %vm1899_vm10, %v1871_v9  ;;  %1011 = vrot.lane.b32.xlu0 %v2739_v25, %s3076_s13 }
 0x1f2   : > { %1202 = vrot.lane.b32.xlu1 %v2770_v34, %s3077_s14 }
 0x1f3   : > { %v1377_v60 = vpop.permute.xlu0 %1376 }
 0x1f4   : > { %v801_v54 = vpop.permute.xlu1 %800  ;;  %1455 = vst.msk [vmem:[#allocation2 + $0x90] sm:$0xff] %vm1436_vm7, %v1377_v60 }
 0x1f5   : > { %877 = vst.msk [vmem:[#allocation2 + $0xa0] sm:$0xff] %vm856_vm4, %v801_v54  ;;  %1780 = vrot.lane.b32.xlu0 %v2771_v55, %s3080_s16 }
 0x1f6   : > { %1204 = vrot.lane.b32.xlu1 %v2771_v55, %s3077_s14 }
 0x1f7   : > { %v1379_v45 = vpop.permute.xlu0 %1378  ;;  %v1872_v47 = vld [vmem:[#allocation2 + $0x88] sm:$0xff] }
 0x1f8   : > { %v1570_v61 = vpop.permute.xlu1 %1569  ;;  %1456 = vst.msk [vmem:[#allocation2 + $0x98] sm:$0xff] %vm1436_vm7, %v1379_v45  ;;  %2887 = vmatmul.mubr.msk.f32.vlgmr.msra.gmra.mrb[0].mxu1 %vm1899_vm10, %v1872_v47 }
 0x1f9   : > { %1648 = vst.msk [vmem:[#allocation2 + $0x90] sm:$0xff] %vm1629_vm8, %v1570_v61  ;;  %1396 = vrot.lane.b32.xlu0 %v2708_v8, %s3078_s25 }
 0x1fa   : > { %820 = vrot.lane.b32.xlu1 %v2708_v8, %s3075_s12 }
 0x1fb   : > { %v803_v27 = vpop.permute.xlu0 %802 }
 0x1fc   : > { %v994_v46 = vpop.permute.xlu1 %993  ;;  %878 = vst.msk [vmem:[#allocation2 + $0xa8] sm:$0xff] %vm856_vm4, %v803_v27 }
 0x1fd   : > { %1070 = vst.msk [vmem:[#allocation2 + $0xa0] sm:$0xff] %vm1049_vm5, %v994_v46  ;;  %1398 = vrot.lane.b32.xlu0 %v2709_v37, %s3078_s25 }
 0x1fe   : > { %1589 = vrot.lane.b32.xlu1 %v2740_v20, %s3079_s10 }
 0x1ff   : > { %v1572_v13 = vpop.permute.xlu0 %1571 }
 0x200   : > { %v1763_v12 = vpop.permute.xlu1 %1762  ;;  %1649 = vst.msk [vmem:[#allocation2 + $0x98] sm:$0xff] %vm1629_vm8, %v1572_v13 }
 0x201   : > { %1841 = vst.msk [vmem:[#allocation2 + $0x90] sm:$0xff] %vm1822_vm9, %v1763_v12  ;;  %822 = vrot.lane.b32.xlu0 %v2709_v37, %s3075_s12  ;;  %s2814_s12 = sshll.u32 %s3163_s30, 8  ;;  %s4342_s30 = sand.u32 1, %s3063_s19  }
 0x202   : > { %1013 = vrot.lane.b32.xlu1 %v2740_v20, %s3076_s13  ;;  %s4099_s26 = scalar_lea.vmem %s4431_s3, %s2814_s12  ;;  %s233_s7 = scalar_lea.vmem [#allocation5], %s4342_s30 }
 0x203   : > { %v996_v26 = vpop.permute.xlu0 %995  ;;  %s2469_s8 = sshll.u32 %s233_s7, 4  ;;  %s4360_s12 = scalar_lea.hbm %s4433_s5, %s2810_s9  ;;  %s4362_s8 = int_to_ptr.vmem [resolvable:$true] %s2469_s8 }
 0x204   : > { %v1187_v19 = vpop.permute.xlu1 %1186  ;;  %1071 = vst.msk [vmem:[#allocation2 + $0xa8] sm:$0xff] %vm1049_vm5, %v996_v26 }
 0x205   : > { %1263 = vst.msk [vmem:[#allocation2 + $0xa0] sm:$0xff] %vm1242_vm6, %v1187_v19  ;;  %1591 = vrot.lane.b32.xlu0 %v2741_v36, %s3079_s10 }
 0x206   : > { %1782 = vrot.lane.b32.xlu1 %v2772_v11, %s3080_s16 }
 0x207   : > { %v1765_v16 = vpop.permute.xlu0 %1764 }
 0x208   : > { %v1189_v10 = vpop.permute.xlu1 %1188  ;;  %v1873_v49 = vld [vmem:[#allocation2 + $0x90] sm:$0xff]  ;;  %1842 = vst.msk [vmem:[#allocation2 + $0x98] sm:$0xff] %vm1822_vm9, %v1765_v16 }
 0x209   : > { %1264 = vst.msk [vmem:[#allocation2 + $0xa8] sm:$0xff] %vm1242_vm6, %v1189_v10  ;;  %2889 = vmatprep.mubr.msk.f32.mxu1 %vm1899_vm10, %v1873_v49  ;;  %1015 = vrot.lane.b32.xlu0 %v2741_v36, %s3076_s13  ;;  %s2437_s13 = scalar_lea.sflag [#allocation4], %s4342_s30 }
 0x20a   : > { %1206 = vrot.lane.b32.xlu1 %v2772_v11, %s3077_s14 }
 0x20b   : > { %v1381_v62 = vpop.permute.xlu0 %1380 }
 0x20c   : > { %v805_v31 = vpop.permute.xlu1 %804  ;;  %1457 = vst.msk [vmem:[#allocation2 + $0xa0] sm:$0xff] %vm1436_vm7, %v1381_v62 }
 0x20d   : > { %879 = vst.msk [vmem:[#allocation2 + $0xb0] sm:$0xff] %vm856_vm4, %v805_v31  ;;  %1784 = vrot.lane.b32.xlu0 %v2773_v48, %s3080_s16 }
 0x20e   : > { %1208 = vrot.lane.b32.xlu1 %v2773_v48, %s3077_s14  ;;  %s3081_s14 = smov [#allocation3]  }
 0x20f   : > { %v1383_v39 = vpop.permute.xlu0 %1382  ;;  %v1874_v15 = vld [vmem:[#allocation2 + $0x98] sm:$0xff]  ;;  %s2981_s23 = sshll.u32 %s3081_s14, 4  ;;  %s2982_s23 = int_to_ptr.vmem [resolvable:$false] %s2981_s23 }
 0x210   : > { %v1574_v56 = vpop.permute.xlu1 %1573  ;;  %1458 = vst.msk [vmem:[#allocation2 + $0xa8] sm:$0xff] %vm1436_vm7, %v1383_v39  ;;  %2890 = vmatmul.mubr.msk.f32.gmra.mrb[2].mxu1 %vm1899_vm10, %v1874_v15 }
 0x211   : > { %1650 = vst.msk [vmem:[#allocation2 + $0xa0] sm:$0xff] %vm1629_vm8, %v1574_v56  ;;  %1400 = vrot.lane.b32.xlu0 %v2710_v5, %s3078_s25 }
 0x212   : > { %1402 = vrot.lane.b32.xlu1 %v2711_v63, %s3078_s25  ;;  %s227_s25 = scalar_lea.vmem [#allocation3], %s4342_s30 }
 0x213   : > { %v807_v14 = vpop.permute.xlu0 %806  ;;  %v2864_v38 = vpop.f32.mrb[0].mxu0  ;;  %s2456_s6 = sshll.u32 %s227_s25, 4  ;;  %s4354_s6 = int_to_ptr.vmem [resolvable:$true] %s2456_s6 }
 0x214   : > { %880 = vst.msk [vmem:[#allocation2 + $0xb8] sm:$0xff] %vm856_vm4, %v807_v14  ;;  %v2072_v51 = vadd.f32 %v2864_v38, %v4092_v28  ;;  %v998_v50 = vpop.permute.xlu1 %997  ;;  %v2066_v1 = vpop.f32.mrb[1].mxu0  ;;  %s2977_s17 = scalar_lea.vmem %s4354_s6, 16  ;;  %p2984_p0 = scmp.lt.s32.totalorder %s4354_s6, %s2982_s23 }
 0x215   : > { %1072 = vst.msk [vmem:[#allocation2 + $0xb0] sm:$0xff] %vm1049_vm5, %v998_v50  ;;  %v2067_v33 = vadd.f32 %v4092_v28, %v2066_v1  ;;  %1593 = vrot.lane.b32.xlu0 %v2742_v57, %s3079_s10  ;;  %p2978_p11 = scmp.ne.s32.totalorder %s4354_s6, %s2977_s17 }
 0x216   : > { %1595 = vrot.lane.b32.xlu1 %v2743_v4, %s3079_s10  ;;  %2227 = vst.msk [vmem:[%s4099_s26 + $0x8] sm:$0xff] %vm2225_vm11, %v2072_v51  ;;  %v2259_v30 = vsel %vm2225_vm11, %v2072_v51, 0.0  ;;  %v2330_v3 = vmul.f32 %v2072_v51, %v2072_v51 }
 0x217   : > { %2226 = vst.msk [vmem:[%s4099_s26] sm:$0xff] %vm2225_vm11, %v2067_v33  ;;  %v2258_v32 = vsel %vm2225_vm11, %v2067_v33, 0.0  ;;  %v2329_v29 = vmul.f32 %v2067_v33, %v2067_v33  ;;  %v1576_v41 = vpop.permute.xlu0 %1575  ;;  %p2979_p12 = pnand %p2978_p11, %p3151_p5 }
 0x218   : > { %v2362_v22 = vsel %vm2225_vm11, %v2330_v3, 0.0  ;;  %v2260_v18 = vadd.f32 %v2259_v30, %v2258_v32  ;;  %1651 = vst.msk [vmem:[#allocation2 + $0xa8] sm:$0xff] %vm1629_vm8, %v1576_v41  ;;  %v1767_v53 = vpop.permute.xlu1 %1766 }
 0x219   : > { %v2361_v0 = vsel %vm2225_vm11, %v2329_v29, 0.0  ;;  %1843 = vst.msk [vmem:[#allocation2 + $0xa0] sm:$0xff] %vm1822_vm9, %v1767_v53  ;;  %1786 = vrot.lane.b32.xlu0 %v2774_v23, %s3080_s16  ;;  %p2980_p13 = pneg %p2979_p12 }
 0x21a   : > { %1788 = vrot.lane.b32.xlu1 %v2775_v21, %s3080_s16  ;;  %v2363_v7 = vadd.f32 %v2362_v22, %v2361_v0 }
 0x21b   : > { %v1000_v52 = vpop.permute.xlu0 %999 }
 0x21c   : > { %1073 = vst.msk [vmem:[#allocation2 + $0xb8] sm:$0xff] %vm1049_vm5, %v1000_v52  ;;  %v1191_v40 = vpop.permute.xlu1 %1190 }
 0x21d   : > { %1265 = vst.msk [vmem:[#allocation2 + $0xb0] sm:$0xff] %vm1242_vm6, %v1191_v40 }
 0x21f   : > { %v1769_v58 = vpop.permute.xlu0 %1768 }
 0x220   : > { %1844 = vst.msk [vmem:[#allocation2 + $0xa8] sm:$0xff] %vm1822_vm9, %v1769_v58  ;;  %v1193_v35 = vpop.permute.xlu1 %1192  ;;  %v1875_v6 = vld [vmem:[#allocation2 + $0xa0] sm:$0xff] }
 0x221   : > { %1266 = vst.msk [vmem:[#allocation2 + $0xb8] sm:$0xff] %vm1242_vm6, %v1193_v35  ;;  %2892 = vmatprep.mubr.msk.f32.mxu1 %vm1899_vm10, %v1875_v6 }
 0x223   : > { %v1385_v59 = vpop.permute.xlu0 %1384 }
 0x224   : > { %1459 = vst.msk [vmem:[#allocation2 + $0xb0] sm:$0xff] %vm1436_vm7, %v1385_v59  ;;  %v809_v43 = vpop.permute.xlu1 %808 }
 0x225   : > { %881 = vst.msk [vmem:[#allocation2 + $0xc0] sm:$0xff] %vm856_vm4, %v809_v43 }
 0x227   : > { %v1387_v2 = vpop.permute.xlu0 %1386  ;;  %v2867_v25 = vpop.f32.mrb[2].mxu0  ;;  %v1876_v34 = vld [vmem:[#allocation2 + $0xa8] sm:$0xff] }
 0x228   : > { %1460 = vst.msk [vmem:[#allocation2 + $0xb8] sm:$0xff] %vm1436_vm7, %v1387_v2  ;;  %v2082_v42 = vadd.f32 %v2867_v25, %v4092_v28  ;;  %v1578_v24 = vpop.permute.xlu1 %1577  ;;  %v2076_v44 = vpop.f32.mrb[3].mxu0  ;;  %2893 = vmatmul.mubr.msk.f32.gmra.mrb[4].mxu1 %vm1899_vm10, %v1876_v34 }
 0x229   : > { %1652 = vst.msk [vmem:[#allocation2 + $0xb0] sm:$0xff] %vm1629_vm8, %v1578_v24  ;;  %v2077_v17 = vadd.f32 %v4092_v28, %v2076_v44 }
 0x22a   : > { %2229 = vst.msk [vmem:[%s4099_s26 + $0x18] sm:$0xff] %vm2225_vm11, %v2082_v42  ;;  %v2332_v9 = vmul.f32 %v2082_v42, %v2082_v42  ;;  %v2263_v61 = vsel %vm2225_vm11, %v2082_v42, 0.0 }
 0x22b   : > { %2228 = vst.msk [vmem:[%s4099_s26 + $0x10] sm:$0xff] %vm2225_vm11, %v2077_v17  ;;  %v2261_v55 = vsel %vm2225_vm11, %v2077_v17, 0.0  ;;  %v2331_v60 = vmul.f32 %v2077_v17, %v2077_v17  ;;  %v811_v54 = vpop.permute.xlu0 %810 }
 0x22c   : > { %v2262_v8 = vadd.f32 %v2261_v55, %v2260_v18  ;;  %882 = vst.msk [vmem:[#allocation2 + $0xc8] sm:$0xff] %vm856_vm4, %v811_v54  ;;  %v1002_v45 = vpop.permute.xlu1 %1001  ;;  %v2366_v27 = vsel %vm2225_vm11, %v2332_v9, 0.0 }
 0x22d   : > { %v2364_v47 = vsel %vm2225_vm11, %v2331_v60, 0.0  ;;  %1074 = vst.msk [vmem:[#allocation2 + $0xc0] sm:$0xff] %vm1049_vm5, %v1002_v45 }
 0x22e   : > { %v2365_v37 = vadd.f32 %v2364_v47, %v2363_v7  ;;  %v2264_v20 = vadd.f32 %v2263_v61, %v2262_v8 }
 0x22f   : > { %v1580_v46 = vpop.permute.xlu0 %1579 }
 0x230   : > { %1653 = vst.msk [vmem:[#allocation2 + $0xb8] sm:$0xff] %vm1629_vm8, %v1580_v46  ;;  %v1771_v13 = vpop.permute.xlu1 %1770  ;;  %v2367_v12 = vadd.f32 %v2366_v27, %v2365_v37 }
 0x231   : > { %1845 = vst.msk [vmem:[#allocation2 + $0xb0] sm:$0xff] %vm1822_vm9, %v1771_v13 }
 0x233   : > { %v1004_v36 = vpop.permute.xlu0 %1003 }
 0x234   : > { %1075 = vst.msk [vmem:[#allocation2 + $0xc8] sm:$0xff] %vm1049_vm5, %v1004_v36  ;;  %v1195_v11 = vpop.permute.xlu1 %1194 }
 0x235   : > { %1267 = vst.msk [vmem:[#allocation2 + $0xc0] sm:$0xff] %vm1242_vm6, %v1195_v11 }
 0x237   : > { %v1773_v26 = vpop.permute.xlu0 %1772 }
 0x238   : > { %1846 = vst.msk [vmem:[#allocation2 + $0xb8] sm:$0xff] %vm1822_vm9, %v1773_v26  ;;  %v1197_v19 = vpop.permute.xlu1 %1196  ;;  %v1877_v16 = vld [vmem:[#allocation2 + $0xb0] sm:$0xff] }
 0x239   : > { %1268 = vst.msk [vmem:[#allocation2 + $0xc8] sm:$0xff] %vm1242_vm6, %v1197_v19  ;;  %2895 = vmatprep.mubr.msk.f32.mxu1 %vm1899_vm10, %v1877_v16 }
 0x23b   : > { %v1389_v10 = vpop.permute.xlu0 %1388  ;;  %v2870_v49 = vpop.f32.mrb[4].mxu0 }
 0x23c   : > { %1461 = vst.msk [vmem:[#allocation2 + $0xc0] sm:$0xff] %vm1436_vm7, %v1389_v10  ;;  %v2092_v48 = vadd.f32 %v2870_v49, %v4092_v28  ;;  %v813_v62 = vpop.permute.xlu1 %812  ;;  %v2086_v31 = vpop.f32.mrb[5].mxu0 }
 0x23d   : > { %883 = vst.msk [vmem:[#allocation2 + $0xd0] sm:$0xff] %vm856_vm4, %v813_v62  ;;  %v2087_v5 = vadd.f32 %v4092_v28, %v2086_v31 }
 0x23e   : > { %2231 = vst.msk [vmem:[%s4099_s26 + $0x28] sm:$0xff] %vm2225_vm11, %v2092_v48  ;;  %v2334_v63 = vmul.f32 %v2092_v48, %v2092_v48  ;;  %v2267_v38 = vsel %vm2225_vm11, %v2092_v48, 0.0 }
 0x23f   : > { %2230 = vst.msk [vmem:[%s4099_s26 + $0x20] sm:$0xff] %vm2225_vm11, %v2087_v5  ;;  %v2265_v39 = vsel %vm2225_vm11, %v2087_v5, 0.0  ;;  %v2333_v56 = vmul.f32 %v2087_v5, %v2087_v5  ;;  %v1391_v15 = vpop.permute.xlu0 %1390  ;;  %v1878_v57 = vld [vmem:[#allocation2 + $0xb8] sm:$0xff] }
 0x240   : > { %v2266_v4 = vadd.f32 %v2265_v39, %v2264_v20  ;;  %1462 = vst.msk [vmem:[#allocation2 + $0xc8] sm:$0xff] %vm1436_vm7, %v1391_v15  ;;  %v1582_v14 = vpop.permute.xlu1 %1581  ;;  %2896 = vmatmul.mubr.msk.f32.gmra.mrb[6].mxu1 %vm1899_vm10, %v1878_v57  ;;  %v2370_v33 = vsel %vm2225_vm11, %v2334_v63, 0.0 }
 0x241   : > { %v2368_v51 = vsel %vm2225_vm11, %v2333_v56, 0.0  ;;  %1654 = vst.msk [vmem:[#allocation2 + $0xc0] sm:$0xff] %vm1629_vm8, %v1582_v14 }
 0x242   : > { %v2369_v50 = vadd.f32 %v2368_v51, %v2367_v12  ;;  %v2268_v1 = vadd.f32 %v2267_v38, %v2266_v4 }
 0x243   : > { %v815_v30 = vpop.permute.xlu0 %814 }
 0x244   : > { %884 = vst.msk [vmem:[#allocation2 + $0xd8] sm:$0xff] %vm856_vm4, %v815_v30  ;;  %v1006_v3 = vpop.permute.xlu1 %1005  ;;  %v2371_v23 = vadd.f32 %v2370_v33, %v2369_v50 }
 0x245   : > { %1076 = vst.msk [vmem:[#allocation2 + $0xd0] sm:$0xff] %vm1049_vm5, %v1006_v3 }
 0x247   : > { %v1584_v21 = vpop.permute.xlu0 %1583 }
 0x248   : > { %1655 = vst.msk [vmem:[#allocation2 + $0xc8] sm:$0xff] %vm1629_vm8, %v1584_v21  ;;  %v1775_v32 = vpop.permute.xlu1 %1774 }
 0x249   : > { %1847 = vst.msk [vmem:[#allocation2 + $0xc0] sm:$0xff] %vm1822_vm9, %v1775_v32 }
 0x24b   : > { %v1008_v29 = vpop.permute.xlu0 %1007 }
 0x24c   : > { %1077 = vst.msk [vmem:[#allocation2 + $0xd8] sm:$0xff] %vm1049_vm5, %v1008_v29  ;;  %v1199_v41 = vpop.permute.xlu1 %1198 }
 0x24d   : > { %1269 = vst.msk [vmem:[#allocation2 + $0xd0] sm:$0xff] %vm1242_vm6, %v1199_v41 }
 0x24f   : > { %v1777_v22 = vpop.permute.xlu0 %1776 }
 0x250   : > { %1848 = vst.msk [vmem:[#allocation2 + $0xc8] sm:$0xff] %vm1822_vm9, %v1777_v22  ;;  %v1201_v18 = vpop.permute.xlu1 %1200  ;;  %v1879_v53 = vld [vmem:[#allocation2 + $0xc0] sm:$0xff] }
 0x251   : > { %1270 = vst.msk [vmem:[#allocation2 + $0xd8] sm:$0xff] %vm1242_vm6, %v1201_v18  ;;  %2898 = vmatprep.mubr.msk.f32.mxu1 %vm1899_vm10, %v1879_v53 }
 0x253   : > { %v1393_v0 = vpop.permute.xlu0 %1392  ;;  %v2873_v7 = vpop.f32.mrb[6].mxu0 }
 0x254   : > { %1463 = vst.msk [vmem:[#allocation2 + $0xd0] sm:$0xff] %vm1436_vm7, %v1393_v0  ;;  %v2102_v52 = vadd.f32 %v2873_v7, %v4092_v28  ;;  %v817_v40 = vpop.permute.xlu1 %816  ;;  %v2096_v58 = vpop.f32.mrb[7].mxu0 }
 0x255   : > { %885 = vst.msk [vmem:[#allocation2 + $0xe0] sm:$0xff] %vm856_vm4, %v817_v40  ;;  %v2097_v35 = vadd.f32 %v4092_v28, %v2096_v58 }
 0x256   : > { %2233 = vst.msk [vmem:[%s4099_s26 + $0x38] sm:$0xff] %vm2225_vm11, %v2102_v52  ;;  %v2336_v6 = vmul.f32 %v2102_v52, %v2102_v52  ;;  %v2271_v24 = vsel %vm2225_vm11, %v2102_v52, 0.0 }
 0x257   : > { %2232 = vst.msk [vmem:[%s4099_s26 + $0x30] sm:$0xff] %vm2225_vm11, %v2097_v35  ;;  %v2269_v59 = vsel %vm2225_vm11, %v2097_v35, 0.0  ;;  %v2335_v43 = vmul.f32 %v2097_v35, %v2097_v35  ;;  %v1395_v2 = vpop.permute.xlu0 %1394  ;;  %v1880_v25 = vld [vmem:[#allocation2 + $0xc8] sm:$0xff] }
 0x258   : > { %v2270_v34 = vadd.f32 %v2269_v59, %v2268_v1  ;;  %1464 = vst.msk [vmem:[#allocation2 + $0xd8] sm:$0xff] %vm1436_vm7, %v1395_v2  ;;  %v1586_v42 = vpop.permute.xlu1 %1585  ;;  %2899 = vmatmul.mubr.msk.f32.gmra.mrb[8].mxu1 %vm1899_vm10, %v1880_v25  ;;  %v2374_v55 = vsel %vm2225_vm11, %v2336_v6, 0.0 }
 0x259   : > { %v2372_v44 = vsel %vm2225_vm11, %v2335_v43, 0.0  ;;  %1656 = vst.msk [vmem:[#allocation2 + $0xd0] sm:$0xff] %vm1629_vm8, %v1586_v42 }
 0x25a   : > { %v2373_v17 = vadd.f32 %v2372_v44, %v2371_v23  ;;  %v2272_v9 = vadd.f32 %v2271_v24, %v2270_v34 }
 0x25b   : > { %v819_v60 = vpop.permute.xlu0 %818 }
 0x25c   : > { %886 = vst.msk [vmem:[#allocation2 + $0xe8] sm:$0xff] %vm856_vm4, %v819_v60  ;;  %v1010_v54 = vpop.permute.xlu1 %1009  ;;  %v2375_v8 = vadd.f32 %v2374_v55, %v2373_v17 }
 0x25d   : > { %1078 = vst.msk [vmem:[#allocation2 + $0xe0] sm:$0xff] %vm1049_vm5, %v1010_v54 }
 0x25f   : > { %v1588_v45 = vpop.permute.xlu0 %1587 }
 0x260   : > { %1657 = vst.msk [vmem:[#allocation2 + $0xd8] sm:$0xff] %vm1629_vm8, %v1588_v45  ;;  %v1779_v61 = vpop.permute.xlu1 %1778 }
 0x261   : > { %1849 = vst.msk [vmem:[#allocation2 + $0xd0] sm:$0xff] %vm1822_vm9, %v1779_v61 }
 0x263   : > { %v1012_v47 = vpop.permute.xlu0 %1011 }
 0x264   : > { %1079 = vst.msk [vmem:[#allocation2 + $0xe8] sm:$0xff] %vm1049_vm5, %v1012_v47  ;;  %v1203_v37 = vpop.permute.xlu1 %1202 }
 0x265   : > { %1271 = vst.msk [vmem:[#allocation2 + $0xe0] sm:$0xff] %vm1242_vm6, %v1203_v37 }
 0x267   : > { %v1781_v20 = vpop.permute.xlu0 %1780 }
 0x268   : > { %1850 = vst.msk [vmem:[#allocation2 + $0xd8] sm:$0xff] %vm1822_vm9, %v1781_v20  ;;  %v1205_v27 = vpop.permute.xlu1 %1204  ;;  %v1881_v46 = vld [vmem:[#allocation2 + $0xd0] sm:$0xff] }
 0x269   : > { %1272 = vst.msk [vmem:[#allocation2 + $0xe8] sm:$0xff] %vm1242_vm6, %v1205_v27  ;;  %2901 = vmatprep.mubr.msk.f32.mxu1 %vm1899_vm10, %v1881_v46 }
 0x26b   : > { %v1397_v13 = vpop.permute.xlu0 %1396  ;;  %v2876_v12 = vpop.f32.mrb[8].mxu0 }
 0x26c   : > { %1465 = vst.msk [vmem:[#allocation2 + $0xe0] sm:$0xff] %vm1436_vm7, %v1397_v13  ;;  %v2112_v36 = vadd.f32 %v2876_v12, %v4092_v28  ;;  %v821_v11 = vpop.permute.xlu1 %820  ;;  %v2106_v26 = vpop.f32.mrb[9].mxu0 }
 0x26d   : > { %887 = vst.msk [vmem:[#allocation2 + $0xf0] sm:$0xff] %vm856_vm4, %v821_v11  ;;  %v2107_v19 = vadd.f32 %v4092_v28, %v2106_v26 }
 0x26e   : > { %2235 = vst.msk [vmem:[%s4099_s26 + $0x48] sm:$0xff] %vm2225_vm11, %v2112_v36  ;;  %v2338_v16 = vmul.f32 %v2112_v36, %v2112_v36  ;;  %v2275_v63 = vsel %vm2225_vm11, %v2112_v36, 0.0 }
 0x26f   : > { %2234 = vst.msk [vmem:[%s4099_s26 + $0x40] sm:$0xff] %vm2225_vm11, %v2107_v19  ;;  %v2273_v10 = vsel %vm2225_vm11, %v2107_v19, 0.0  ;;  %v2337_v49 = vmul.f32 %v2107_v19, %v2107_v19  ;;  %v1399_v48 = vpop.permute.xlu0 %1398  ;;  %v1882_v62 = vld [vmem:[#allocation2 + $0xd8] sm:$0xff] }
 0x270   : > { %v2274_v31 = vadd.f32 %v2273_v10, %v2272_v9  ;;  %1466 = vst.msk [vmem:[#allocation2 + $0xe8] sm:$0xff] %vm1436_vm7, %v1399_v48  ;;  %v1590_v5 = vpop.permute.xlu1 %1589  ;;  %2902 = vmatmul.mubr.msk.f32.gmra.mrb[10].mxu1 %vm1899_vm10, %v1882_v62  ;;  %v2378_v57 = vsel %vm2225_vm11, %v2338_v16, 0.0 }
 0x271   : > { %v2376_v39 = vsel %vm2225_vm11, %v2337_v49, 0.0  ;;  %1658 = vst.msk [vmem:[#allocation2 + $0xe0] sm:$0xff] %vm1629_vm8, %v1590_v5 }
 0x272   : > { %v2377_v56 = vadd.f32 %v2376_v39, %v2375_v8  ;;  %v2276_v15 = vadd.f32 %v2275_v63, %v2274_v31 }
 0x273   : > { %v823_v4 = vpop.permute.xlu0 %822 }
 0x274   : > { %888 = vst.msk [vmem:[#allocation2 + $0xf8] sm:$0xff] %vm856_vm4, %v823_v4  ;;  %v1014_v14 = vpop.permute.xlu1 %1013  ;;  %v2379_v38 = vadd.f32 %v2378_v57, %v2377_v56 }
 0x275   : > { %1080 = vst.msk [vmem:[#allocation2 + $0xf0] sm:$0xff] %vm1049_vm5, %v1014_v14 }
 0x277   : > { %v1592_v51 = vpop.permute.xlu0 %1591 }
 0x278   : > { %1659 = vst.msk [vmem:[#allocation2 + $0xe8] sm:$0xff] %vm1629_vm8, %v1592_v51  ;;  %v1783_v50 = vpop.permute.xlu1 %1782 }
 0x279   : > { %1851 = vst.msk [vmem:[#allocation2 + $0xe0] sm:$0xff] %vm1822_vm9, %v1783_v50 }
 0x27b   : > { %v1016_v1 = vpop.permute.xlu0 %1015 }
 0x27c   : > { %1081 = vst.msk [vmem:[#allocation2 + $0xf8] sm:$0xff] %vm1049_vm5, %v1016_v1  ;;  %v1207_v33 = vpop.permute.xlu1 %1206 }
 0x27d   : > { %1273 = vst.msk [vmem:[#allocation2 + $0xf0] sm:$0xff] %vm1242_vm6, %v1207_v33 }
 0x27f   : > { %v1785_v30 = vpop.permute.xlu0 %1784 }
 0x280   : > { %1852 = vst.msk [vmem:[#allocation2 + $0xe8] sm:$0xff] %vm1822_vm9, %v1785_v30  ;;  %v1209_v3 = vpop.permute.xlu1 %1208  ;;  %v1883_v23 = vld [vmem:[#allocation2 + $0xe0] sm:$0xff] }
 0x281   : > { %1274 = vst.msk [vmem:[#allocation2 + $0xf8] sm:$0xff] %vm1242_vm6, %v1209_v3  ;;  %2904 = vmatprep.mubr.msk.f32.mxu1 %vm1899_vm10, %v1883_v23 }
 0x283   : > { %v1401_v21 = vpop.permute.xlu0 %1400  ;;  %v2879_v32 = vpop.f32.mrb[10].mxu0 }
 0x284   : > { %1467 = vst.msk [vmem:[#allocation2 + $0xf0] sm:$0xff] %vm1436_vm7, %v1401_v21  ;;  %v2122_v29 = vadd.f32 %v2879_v32, %v4092_v28  ;;  %v1403_v41 = vpop.permute.xlu1 %1402  ;;  %v2116_v22 = vpop.f32.mrb[11].mxu0 }
 0x285   : > { %1468 = vst.msk [vmem:[#allocation2 + $0xf8] sm:$0xff] %vm1436_vm7, %v1403_v41  ;;  %v2117_v18 = vadd.f32 %v4092_v28, %v2116_v22 }
 0x286   : > { %2237 = vst.msk [vmem:[%s4099_s26 + $0x58] sm:$0xff] %vm2225_vm11, %v2122_v29  ;;  %v2340_v53 = vmul.f32 %v2122_v29, %v2122_v29  ;;  %v2279_v6 = vsel %vm2225_vm11, %v2122_v29, 0.0 }
 0x287   : > { %2236 = vst.msk [vmem:[%s4099_s26 + $0x50] sm:$0xff] %vm2225_vm11, %v2117_v18  ;;  %v2277_v0 = vsel %vm2225_vm11, %v2117_v18, 0.0  ;;  %v2339_v7 = vmul.f32 %v2117_v18, %v2117_v18  ;;  %v1594_v52 = vpop.permute.xlu0 %1593  ;;  %v1884_v40 = vld [vmem:[#allocation2 + $0xe8] sm:$0xff] }
 0x288   : > { %v2278_v58 = vadd.f32 %v2277_v0, %v2276_v15  ;;  %1660 = vst.msk [vmem:[#allocation2 + $0xf0] sm:$0xff] %vm1629_vm8, %v1594_v52  ;;  %v1596_v35 = vpop.permute.xlu1 %1595  ;;  %2905 = vmatmul.mubr.msk.f32.gmra.mrb[12].mxu1 %vm1899_vm10, %v1884_v40  ;;  %v2382_v25 = vsel %vm2225_vm11, %v2340_v53, 0.0 }
 0x289   : > { %v2380_v59 = vsel %vm2225_vm11, %v2339_v7, 0.0  ;;  %1661 = vst.msk [vmem:[#allocation2 + $0xf8] sm:$0xff] %vm1629_vm8, %v1596_v35 }
 0x28a   : > { %v2381_v43 = vadd.f32 %v2380_v59, %v2379_v38  ;;  %v2280_v2 = vadd.f32 %v2279_v6, %v2278_v58 }
 0x28b   : > { %v1787_v34 = vpop.permute.xlu0 %1786 }
 0x28c   : > { %1853 = vst.msk [vmem:[#allocation2 + $0xf0] sm:$0xff] %vm1822_vm9, %v1787_v34  ;;  %v1789_v42 = vpop.permute.xlu1 %1788  ;;  %v2383_v24 = vadd.f32 %v2382_v25, %v2381_v43 }
 0x28d   : > { %1854 = vst.msk [vmem:[#allocation2 + $0xf8] sm:$0xff] %vm1822_vm9, %v1789_v42 }
 0x293   : > { %v1885_v44 = vld [vmem:[#allocation2 + $0xf0] sm:$0xff] }
 0x294   : > { %2907 = vmatprep.mubr.msk.f32.mxu1 %vm1899_vm10, %v1885_v44  ;;  %v1886_v17 = vld [vmem:[#allocation2 + $0xf8] sm:$0xff] }
 0x295   : > { %2908 = vmatmul.mubr.msk.f32.gmra.mrb[14].mxu1 %vm1899_vm10, %v1886_v17 }
 0x29b   : > { %v2882_v9 = vpop.f32.mrb[12].mxu0 }
 0x29c   : > { %v2132_v55 = vadd.f32 %v2882_v9, %v4092_v28  ;;  %v2126_v60 = vpop.f32.mrb[13].mxu0 }
 0x29d   : > { %v2127_v54 = vadd.f32 %v4092_v28, %v2126_v60 }
 0x29e   : > { %2239 = vst.msk [vmem:[%s4099_s26 + $0x68] sm:$0xff] %vm2225_vm11, %v2132_v55  ;;  %v2342_v8 = vmul.f32 %v2132_v55, %v2132_v55  ;;  %v2283_v37 = vsel %vm2225_vm11, %v2132_v55, 0.0 }
 0x29f   : > { %2238 = vst.msk [vmem:[%s4099_s26 + $0x60] sm:$0xff] %vm2225_vm11, %v2127_v54  ;;  %v2281_v45 = vsel %vm2225_vm11, %v2127_v54, 0.0  ;;  %v2341_v61 = vmul.f32 %v2127_v54, %v2127_v54 }
 0x2a0   : > { %v2282_v47 = vadd.f32 %v2281_v45, %v2280_v2  ;;  %v2386_v13 = vsel %vm2225_vm11, %v2342_v8, 0.0 }
 0x2a1   : > { %v2384_v20 = vsel %vm2225_vm11, %v2341_v61, 0.0 }
 0x2a2   : > { %v2385_v27 = vadd.f32 %v2384_v20, %v2383_v24  ;;  %v2284_v46 = vadd.f32 %v2283_v37, %v2282_v47 }
 0x2a4   : > { %v2387_v12 = vadd.f32 %v2386_v13, %v2385_v27 }
 0x2b3   : > { %v2885_v36 = vpop.f32.mrb[14].mxu0 }
 0x2b4   : > { %v2142_v11 = vadd.f32 %v2885_v36, %v4092_v28  ;;  %v2136_v26 = vpop.f32.mrb[15].mxu0 }
 0x2b5   : > { %v2137_v19 = vadd.f32 %v4092_v28, %v2136_v26 }
 0x2b6   : > { %2241 = vst.msk [vmem:[%s4099_s26 + $0x78] sm:$0xff] %vm2225_vm11, %v2142_v11  ;;  %v2344_v16 = vmul.f32 %v2142_v11, %v2142_v11  ;;  %v2287_v62 = vsel %vm2225_vm11, %v2142_v11, 0.0 }
 0x2b7   : > { %2240 = vst.msk [vmem:[%s4099_s26 + $0x70] sm:$0xff] %vm2225_vm11, %v2137_v19  ;;  %v2285_v10 = vsel %vm2225_vm11, %v2137_v19, 0.0  ;;  %v2343_v49 = vmul.f32 %v2137_v19, %v2137_v19 }
 0x2b8   : > { %v2286_v48 = vadd.f32 %v2285_v10, %v2284_v46  ;;  %v2390_v39 = vsel %vm2225_vm11, %v2344_v16, 0.0 }
 0x2b9   : > { %v2388_v31 = vsel %vm2225_vm11, %v2343_v49, 0.0 }
 0x2ba   : > { %v2389_v5 = vadd.f32 %v2388_v31, %v2387_v12  ;;  %v2288_v63 = vadd.f32 %v2287_v62, %v2286_v48 }
 0x2bc   : > { %v2391_v56 = vadd.f32 %v2390_v39, %v2389_v5 }
 0x2cb   : > { %v2888_v15 = vpop.f32.mrb[0].mxu1 }
 0x2cc   : > { %v2152_v57 = vadd.f32 %v2888_v15, %v4092_v28  ;;  %v2146_v4 = vpop.f32.mrb[1].mxu1 }
 0x2cd   : > { %v2147_v14 = vadd.f32 %v4092_v28, %v2146_v4 }
 0x2ce   : > { %2243 = vst.msk [vmem:[%s4099_s26 + $0x88] sm:$0xff] %vm2225_vm11, %v2152_v57  ;;  %v2346_v38 = vmul.f32 %v2152_v57, %v2152_v57  ;;  %v2291_v33 = vsel %vm2225_vm11, %v2152_v57, 0.0 }
 0x2cf   : > { %2242 = vst.msk [vmem:[%s4099_s26 + $0x80] sm:$0xff] %vm2225_vm11, %v2147_v14  ;;  %v2289_v51 = vsel %vm2225_vm11, %v2147_v14, 0.0  ;;  %v2345_v50 = vmul.f32 %v2147_v14, %v2147_v14 }
 0x2d0   : > { %v2290_v1 = vadd.f32 %v2289_v51, %v2288_v63  ;;  %v2394_v21 = vsel %vm2225_vm11, %v2346_v38, 0.0 }
 0x2d1   : > { %v2392_v30 = vsel %vm2225_vm11, %v2345_v50, 0.0 }
 0x2d2   : > { %v2393_v3 = vadd.f32 %v2392_v30, %v2391_v56  ;;  %v2292_v23 = vadd.f32 %v2291_v33, %v2290_v1 }
 0x2d4   : > { %v2395_v32 = vadd.f32 %v2394_v21, %v2393_v3 }
 0x2e3   : > { %v2891_v29 = vpop.f32.mrb[2].mxu1 }
 0x2e4   : > { %v2162_v41 = vadd.f32 %v2891_v29, %v4092_v28  ;;  %v2156_v22 = vpop.f32.mrb[3].mxu1 }
 0x2e5   : > { %v2157_v18 = vadd.f32 %v4092_v28, %v2156_v22 }
 0x2e6   : > { %2245 = vst.msk [vmem:[%s4099_s26 + $0x98] sm:$0xff] %vm2225_vm11, %v2162_v41  ;;  %v2348_v53 = vmul.f32 %v2162_v41, %v2162_v41  ;;  %v2295_v40 = vsel %vm2225_vm11, %v2162_v41, 0.0 }
 0x2e7   : > { %2244 = vst.msk [vmem:[%s4099_s26 + $0x90] sm:$0xff] %vm2225_vm11, %v2157_v18  ;;  %v2293_v0 = vsel %vm2225_vm11, %v2157_v18, 0.0  ;;  %v2347_v7 = vmul.f32 %v2157_v18, %v2157_v18 }
 0x2e8   : > { %v2294_v52 = vadd.f32 %v2293_v0, %v2292_v23  ;;  %v2398_v59 = vsel %vm2225_vm11, %v2348_v53, 0.0 }
 0x2e9   : > { %v2396_v58 = vsel %vm2225_vm11, %v2347_v7, 0.0 }
 0x2ea   : > { %v2397_v35 = vadd.f32 %v2396_v58, %v2395_v32  ;;  %v2296_v6 = vadd.f32 %v2295_v40, %v2294_v52 }
 0x2ec   : > { %v2399_v43 = vadd.f32 %v2398_v59, %v2397_v35 }
 0x2fb   : > { %v2894_v2 = vpop.f32.mrb[4].mxu1 }
 0x2fc   : > { %v2172_v25 = vadd.f32 %v2894_v2, %v4092_v28  ;;  %v2166_v34 = vpop.f32.mrb[5].mxu1 }
 0x2fd   : > { %v2167_v42 = vadd.f32 %v4092_v28, %v2166_v34 }
 0x2fe   : > { %2247 = vst.msk [vmem:[%s4099_s26 + $0xa8] sm:$0xff] %vm2225_vm11, %v2172_v25  ;;  %v2350_v24 = vmul.f32 %v2172_v25, %v2172_v25  ;;  %v2299_v55 = vsel %vm2225_vm11, %v2172_v25, 0.0 }
 0x2ff   : > { %2246 = vst.msk [vmem:[%s4099_s26 + $0xa0] sm:$0xff] %vm2225_vm11, %v2167_v42  ;;  %v2297_v44 = vsel %vm2225_vm11, %v2167_v42, 0.0  ;;  %v2349_v17 = vmul.f32 %v2167_v42, %v2167_v42 }
 0x300   : > { %v2298_v9 = vadd.f32 %v2297_v44, %v2296_v6  ;;  %v2402_v45 = vsel %vm2225_vm11, %v2350_v24, 0.0 }
 0x301   : > { %v2400_v60 = vsel %vm2225_vm11, %v2349_v17, 0.0 }
 0x302   : > { %v2401_v54 = vadd.f32 %v2400_v60, %v2399_v43  ;;  %v2300_v8 = vadd.f32 %v2299_v55, %v2298_v9 }
 0x304   : > { %v2403_v61 = vadd.f32 %v2402_v45, %v2401_v54 }
 0x313   : > { %v2897_v47 = vpop.f32.mrb[6].mxu1 }
 0x314   : > { %v2182_v37 = vadd.f32 %v2897_v47, %v4092_v28  ;;  %v2176_v20 = vpop.f32.mrb[7].mxu1 }
 0x315   : > { %v2177_v27 = vadd.f32 %v4092_v28, %v2176_v20 }
 0x316   : > { %2249 = vst.msk [vmem:[%s4099_s26 + $0xb8] sm:$0xff] %vm2225_vm11, %v2182_v37  ;;  %v2352_v46 = vmul.f32 %v2182_v37, %v2182_v37  ;;  %v2303_v11 = vsel %vm2225_vm11, %v2182_v37, 0.0 }
 0x317   : > { %2248 = vst.msk [vmem:[%s4099_s26 + $0xb0] sm:$0xff] %vm2225_vm11, %v2177_v27  ;;  %v2301_v13 = vsel %vm2225_vm11, %v2177_v27, 0.0  ;;  %v2351_v12 = vmul.f32 %v2177_v27, %v2177_v27 }
 0x318   : > { %v2302_v36 = vadd.f32 %v2301_v13, %v2300_v8  ;;  %v2406_v10 = vsel %vm2225_vm11, %v2352_v46, 0.0 }
 0x319   : > { %v2404_v26 = vsel %vm2225_vm11, %v2351_v12, 0.0 }
 0x31a   : > { %v2405_v19 = vadd.f32 %v2404_v26, %v2403_v61  ;;  %v2304_v16 = vadd.f32 %v2303_v11, %v2302_v36 }
 0x31c   : > { %v2407_v49 = vadd.f32 %v2406_v10, %v2405_v19 }
 0x32b   : > { %v2900_v48 = vpop.f32.mrb[8].mxu1 }
 0x32c   : > { %v2192_v62 = vadd.f32 %v2900_v48, %v4092_v28  ;;  %v2186_v31 = vpop.f32.mrb[9].mxu1 }
 0x32d   : > { %v2187_v5 = vadd.f32 %v4092_v28, %v2186_v31 }
 0x32e   : > { %2251 = vst.msk [vmem:[%s4099_s26 + $0xc8] sm:$0xff] %vm2225_vm11, %v2192_v62  ;;  %v2354_v63 = vmul.f32 %v2192_v62, %v2192_v62  ;;  %v2307_v57 = vsel %vm2225_vm11, %v2192_v62, 0.0 }
 0x32f   : > { %2250 = vst.msk [vmem:[%s4099_s26 + $0xc0] sm:$0xff] %vm2225_vm11, %v2187_v5  ;;  %v2305_v39 = vsel %vm2225_vm11, %v2187_v5, 0.0  ;;  %v2353_v56 = vmul.f32 %v2187_v5, %v2187_v5 }
 0x330   : > { %v2306_v15 = vadd.f32 %v2305_v39, %v2304_v16  ;;  %v2410_v51 = vsel %vm2225_vm11, %v2354_v63, 0.0 }
 0x331   : > { %v2408_v4 = vsel %vm2225_vm11, %v2353_v56, 0.0 }
 0x332   : > { %v2409_v14 = vadd.f32 %v2408_v4, %v2407_v49  ;;  %v2308_v38 = vadd.f32 %v2307_v57, %v2306_v15 }
 0x334   : > { %v2411_v50 = vadd.f32 %v2410_v51, %v2409_v14 }
 0x343   : > { %v2903_v1 = vpop.f32.mrb[10].mxu1 }
 0x344   : > { %v2202_v33 = vadd.f32 %v2903_v1, %v4092_v28  ;;  %v2196_v30 = vpop.f32.mrb[11].mxu1 }
 0x345   : > { %v2197_v3 = vadd.f32 %v4092_v28, %v2196_v30 }
 0x346   : > { %2253 = vst.msk [vmem:[%s4099_s26 + $0xd8] sm:$0xff] %vm2225_vm11, %v2202_v33  ;;  %v2356_v23 = vmul.f32 %v2202_v33, %v2202_v33  ;;  %v2311_v41 = vsel %vm2225_vm11, %v2202_v33, 0.0 }
 0x347   : > { %2252 = vst.msk [vmem:[%s4099_s26 + $0xd0] sm:$0xff] %vm2225_vm11, %v2197_v3  ;;  %v2309_v21 = vsel %vm2225_vm11, %v2197_v3, 0.0  ;;  %v2355_v32 = vmul.f32 %v2197_v3, %v2197_v3 }
 0x348   : > { %v2310_v29 = vadd.f32 %v2309_v21, %v2308_v38  ;;  %v2414_v0 = vsel %vm2225_vm11, %v2356_v23, 0.0 }
 0x349   : > { %v2412_v22 = vsel %vm2225_vm11, %v2355_v32, 0.0 }
 0x34a   : > { %v2413_v18 = vadd.f32 %v2412_v22, %v2411_v50  ;;  %v2312_v53 = vadd.f32 %v2311_v41, %v2310_v29 }
 0x34c   : > { %v2415_v7 = vadd.f32 %v2414_v0, %v2413_v18 }
 0x35b   : > { %v2906_v52 = vpop.f32.mrb[12].mxu1 }
 0x35c   : > { %v2212_v40 = vadd.f32 %v2906_v52, %v4092_v28  ;;  %v2206_v58 = vpop.f32.mrb[13].mxu1 }
 0x35d   : > { %v2207_v35 = vadd.f32 %v4092_v28, %v2206_v58 }
 0x35e   : > { %2255 = vst.msk [vmem:[%s4099_s26 + $0xe8] sm:$0xff] %vm2225_vm11, %v2212_v40  ;;  %v2358_v6 = vmul.f32 %v2212_v40, %v2212_v40  ;;  %v2315_v25 = vsel %vm2225_vm11, %v2212_v40, 0.0 }
 0x35f   : > { %2254 = vst.msk [vmem:[%s4099_s26 + $0xe0] sm:$0xff] %vm2225_vm11, %v2207_v35  ;;  %v2313_v59 = vsel %vm2225_vm11, %v2207_v35, 0.0  ;;  %v2357_v43 = vmul.f32 %v2207_v35, %v2207_v35 }
 0x360   : > { %v2314_v2 = vadd.f32 %v2313_v59, %v2312_v53  ;;  %v2418_v44 = vsel %vm2225_vm11, %v2358_v6, 0.0 }
 0x361   : > { %v2416_v34 = vsel %vm2225_vm11, %v2357_v43, 0.0 }
 0x362   : > { %v2417_v42 = vadd.f32 %v2416_v34, %v2415_v7  ;;  %v2316_v24 = vadd.f32 %v2315_v25, %v2314_v2 }
 0x364   : > { %v2419_v17 = vadd.f32 %v2418_v44, %v2417_v42 }
 0x368   : > { %v2909_v9 = vpop.f32.mrb[14].mxu1 }
 0x369   : > { %v2222_v55 = vadd.f32 %v2909_v9, %v4092_v28  ;;  %v2216_v60 = vpop.f32.mrb[15].mxu1 }
 0x36a   : > { %v2217_v54 = vadd.f32 %v4092_v28, %v2216_v60 }
 0x36b   : > { %2257 = vst.msk [vmem:[%s4099_s26 + $0xf8] sm:$0xff] %vm2225_vm11, %v2222_v55  ;;  %v2360_v8 = vmul.f32 %v2222_v55, %v2222_v55  ;;  %v2319_v37 = vsel %vm2225_vm11, %v2222_v55, 0.0 }
 0x36c   : > { %2256 = vst.msk [vmem:[%s4099_s26 + $0xf0] sm:$0xff] %vm2225_vm11, %v2217_v54  ;;  %v2317_v45 = vsel %vm2225_vm11, %v2217_v54, 0.0  ;;  %v2359_v61 = vmul.f32 %v2217_v54, %v2217_v54  ;;  %s2983_s26 = scalar_lea.vmem %s2982_s23, 32 }
 0x36d   : > { %v2318_v47 = vadd.f32 %v2317_v45, %v2316_v24  ;;  %v2422_v13 = vsel %vm2225_vm11, %v2360_v8, 0.0  ;;  %p2985_p1 = scmp.lt.s32.totalorder %s2983_s26, %s2977_s17 }
 0x36e   : > { %v2420_v20 = vsel %vm2225_vm11, %v2359_v61, 0.0 }
 0x36f   : > { %v2320_v27 = vadd.f32 %v2319_v37, %v2318_v47  ;;  %v2421_v46 = vadd.f32 %v2420_v20, %v2419_v17  ;;  %p2986_p2 = por %p2985_p1, %p2984_p0 }
 0x371   : > { %v2321_v12 = vrot.slane %v2320_v27, 4  ;;  %v2423_v28 = vadd.f32 %v2422_v13, %v2421_v46  ;;  %p2987_p3 = pnand %p2986_p2, %p2980_p13 }
 0x373   : > { %v2322_v36 = vadd.f32 %v2321_v12, %v2320_v27  ;;  %v2424_v11 = vrot.slane %v2423_v28, 4 }
 0x375   : > { %v2323_v26 = vrot.slane %v2322_v36, 2  ;;  %v2425_v19 = vadd.f32 %v2424_v11, %v2423_v28 }
 0x377   : > { %v2324_v16 = vadd.f32 %v2323_v26, %v2322_v36  ;;  %v2426_v10 = vrot.slane %v2425_v19, 2 }
 0x379   : > { %v2325_v49 = vrot.slane %v2324_v16, 1  ;;  %v2427_v48 = vadd.f32 %v2426_v10, %v2425_v19 }
 0x37b   : > { %v2326_v62 = vadd.f32 %v2325_v49, %v2324_v16  ;;  %v2428_v31 = vrot.slane %v2427_v48, 1 }
 0x37d   : > { %2328 = vst.msk [vmem:[%s227_s25] sm:$0x1] %vm2327_vm12, %v2326_v62  ;;  %v2429_v5 = vadd.f32 %v2428_v31, %v2427_v48 }
 0x37e   : > { %2990 = shalt.err (!%p2987_p3)
}
 0x37f   : > { %s2991_s9 = scalar_lea.hbm %s4352_s15, 16  ;;  %s2995_s11 = scalar_lea.hbm %s4432_s4, 32 }
 0x380   : > { %p2992_p4 = scmp.ne.s32.totalorder %s4352_s15, %s2991_s9  ;;  %p2996_p9 = scmp.lt.u32.totalorder %s4352_s15, %s4432_s4 }
 0x381   : > { %p2997_p10 = scmp.lt.u32.totalorder %s2995_s11, %s2991_s9  ;;  %p2999_p12 = scmp.lt.u32.totalorder %s2991_s9, %s4352_s15 }
 0x382   : > { %p2993_p7 = pnand %p2992_p4, %p3151_p5 }
 0x383   : > { %p2998_p11 = por %p2997_p10, %p2996_p9 }
 0x384   : > { %p2994_p8 = pneg %p2993_p7 }
 0x385   : > { %p3000_p13 = por %p2999_p12, %p2998_p11 }
 0x387   : > { %p3001_p0 = pnand %p3000_p13, %p2994_p8 }
 0x389   : > { %3004 = shalt.err (!%p3001_p0)
}
 0x38a   : > { %2925 = dma.vmem_to_hbm [thread:$0]  (%p3151_p5), %s4354_s6, 16, %s4352_s15, %s2437_s13   ;;  %2430 = vst.msk [vmem:[%s233_s7] sm:$0x1] %vm2327_vm12, %v2429_v5 }
 0x38b   : > { %s2441_s17 = scalar_lea.sflag [#allocation6], %s4342_s30  ;;  %s3005_s14 = scalar_lea.vmem %s4362_s8, 16 }
 0x38c   : > { %p3006_p1 = scmp.ne.s32.totalorder %s4362_s8, %s3005_s14  ;;  %s3082_s23 = smov [#allocation5]  }
 0x38d   : > { %s3009_s26 = sshll.u32 %s3082_s23, 4  ;;  %s3010_s26 = int_to_ptr.vmem [resolvable:$false] %s3009_s26 }
 0x38e   : > { %p3007_p2 = pnand %p3006_p1, %p3151_p5  ;;  %s3011_s9 = scalar_lea.vmem %s3010_s26, 32 }
 0x38f   : > { %p3012_p4 = scmp.lt.s32.totalorder %s4362_s8, %s3010_s26  ;;  %p3013_p7 = scmp.lt.s32.totalorder %s3011_s9, %s3005_s14 }
 0x390   : > { %p3008_p3 = pneg %p3007_p2 }
 0x391   : > { %p3014_p8 = por %p3013_p7, %p3012_p4 }
 0x393   : > { %p3015_p9 = pnand %p3014_p8, %p3008_p3 }
 0x395   : > { %3018 = shalt.err (!%p3015_p9)
}
 0x396   : > { %s3019_s30 = scalar_lea.hbm %s4360_s12, 16  ;;  %s3023_s15 = scalar_lea.hbm %s4433_s5, 32 }
 0x397   : > { %p3020_p10 = scmp.ne.s32.totalorder %s4360_s12, %s3019_s30  ;;  %p3024_p13 = scmp.lt.u32.totalorder %s4360_s12, %s4433_s5 }
 0x398   : > { %p3025_p0 = scmp.lt.u32.totalorder %s3023_s15, %s3019_s30  ;;  %p3027_p2 = scmp.lt.u32.totalorder %s3019_s30, %s4360_s12 }
 0x399   : > { %p3021_p11 = pnand %p3020_p10, %p3151_p5 }
 0x39a   : > { %p3026_p1 = por %p3025_p0, %p3024_p13 }
 0x39b   : > { %p3022_p12 = pneg %p3021_p11 }
 0x39c   : > { %p3028_p3 = por %p3027_p2, %p3026_p1 }
 0x39e   : > { %p3029_p4 = pnand %p3028_p3, %p3022_p12 }
 0x3a0   : > { %3032 = shalt.err (!%p3029_p4)
}
 0x3a1   : > { %2926 = dma.vmem_to_hbm [thread:$0]  (%p3151_p5), %s4362_s8, 16, %s4360_s12, %s2441_s17  }
 0x3a2 PF: > { %p2936_p7 = scmp.ge.s32.totalorder %s3071_s21, 2  ;;  %s2489_s10 = sand.u32 1, %s3059_s18  }
 0x3a3   : > { %s2490_s11 = scalar_lea.sflag [#allocation4], %s2489_s10 }
 0x3a4   : > { %p2930_p8 = pnand %p2936_p7, %p3155_p6 }
 0x3a6   : > { %3050 = dma.done.wait (!%p2930_p8), %s2490_s11, 16  }
 0x3a7   : > { %3052 = vsyncadd (!%p2930_p8), %s2490_s11, 4294967280  ;;  %s2498_s22 = scalar_lea.sflag [#allocation6], %s2489_s10 }
 0x3a8   : > { %3054 = dma.done.wait (!%p2930_p8), %s2498_s22, 16  }
 0x3a9   : > { %3056 = vsyncadd (!%p2930_p8), %s2498_s22, 4294967280  ;;  %p19_p5 = scmp.ge.s32.totalorder %s3138_s24, 4   ;;  %s4436_s18 = smov %s3063_s19 }
 0x3aa   : > { %s4437_s19 = smov %s3067_s20  ;;  %s4438_s20 = smov %s3149_s27 }
 0x3ab   : > { %s4439_s21 = smov %s3138_s24  ;;  %21 = sbr.rel (!%p19_p5) target bundleno = 5 (0x5), region = 98 }
 0x3b2   :  { %2502 = vsyncpa [#allocation4], 1 }
 0x3b3   :  { %2504 = vsyncpa [#allocation4 + $0x1], 1 }
 0x3b4   :  { %2505 = vsyncpa [#allocation6], 1 }
 0x3b5   :  { %2507 = vsyncpa [#allocation6 + $0x1], 1 }

</bundles_post_ra>
